<compile_context>
chip_gen: v7x
topology: tpu7x:2x2x1
jax: 0.10.0
libtpu: 0.0.40
codegen_flags: <defaults>
</compile_context>

<pallas_src>
import numpy as np
import jax
import jax.numpy as jnp
from jax.experimental import pallas as pl
from jax.experimental.pallas import tpu as pltpu

HIDDEN = 128          # per-head hidden width (fixed by the module)
IN_FEATURES = 1920    # fixed by nn.Linear(1920, ...)


def _metanet_kernel(x_ref, wh_ref, bh_ref, wfc_ref, bfc_ref, out_ref):
    # x:   (B_pad, F)            bf16  -- resident (cast/pad once in wrapper)
    # wh:  (hps, F, HIDDEN)      bf16  -- this step's contiguous hidden-weight slab
    # bh:  (N, 1, HIDDEN)        f32   -- resident
    # wfc: (hps, HIDDEN, P_pad)  bf16  -- this step's fc heads (zero-padded)
    # bfc: (N, 1, P_pad)         f32   -- resident
    # out: (hps, B_pad, P_pad)   f32
    g = pl.program_id(0)
    hps = out_ref.shape[0]
    x = x_ref[...]

    for j in range(hps):                               # static unroll
        head = g * hps + j
        h = jnp.dot(x, wh_ref[j], preferred_element_type=jnp.float32)
        h = jnp.maximum(h + bh_ref[head], 0.0)         # (B_pad, HIDDEN)
        o = jnp.dot(h.astype(jnp.bfloat16), wfc_ref[j],
                    preferred_element_type=jnp.float32)
        out_ref[j] = (o + bfc_ref[head]).astype(out_ref.dtype)


def _pick_heads_per_step(n_heads, b_pad, p_pad, min_steps=2,
                         vmem_budget=12 * 1024 * 1024):
    """Largest heads-per-step (divisor of N) s.t. grid length >= min_steps and
    the double-buffered working set stays under a conservative VMEM budget."""
    per_head = 2 * (IN_FEATURES * HIDDEN * 2       # wh slab (bf16), dbl-buffered
                    + HIDDEN * p_pad * 2           # wfc slab (bf16)
                    + b_pad * p_pad * 4)           # out slab (f32)
    resident = b_pad * IN_FEATURES * 2 + n_heads * 8 * (HIDDEN + p_pad) * 4
    best = 1
    for d in range(1, n_heads + 1):
        if n_heads % d != 0:
            continue
        if n_heads // d < min_steps:
            break                                   # steps only shrink from here
        if resident + d * per_head <= vmem_budget:
            best = d
    return best


def pack_metanet_params(w_hidden_t, b_hidden, fc_weights_t, fc_biases, param_sizes):
    """One-time host-side packing of MetaNet parameters for the kernel.

    W_hidden is re-laid-out per head as (N, F, HIDDEN) so each grid step's
    weight slab is contiguous in HBM.  Weights are bf16 (halves HBM bytes on
    this bandwidth-bound kernel); biases stay f32.
    """
    N = len(param_sizes)
    w_hidden_t = np.asarray(w_hidden_t, np.float32)
    assert w_hidden_t.shape == (IN_FEATURES, HIDDEN * N)
    P_pad = ((max(param_sizes) + 127) // 128) * 128

    # (F, N*HIDDEN) -> (N, F, HIDDEN): head i = columns [i*128, (i+1)*128).
    wh = w_hidden_t.reshape(IN_FEATURES, N, HIDDEN).transpose(1, 0, 2).copy()
    bh = np.asarray(b_hidden, np.float32).reshape(N, 1, HIDDEN)

    wfc = np.zeros((N, HIDDEN, P_pad), np.float32)
    bfc = np.zeros((N, 1, P_pad), np.float32)
    for i, p in enumerate(param_sizes):
        wfc[i, :, :p] = np.asarray(fc_weights_t[i], np.float32)
        bfc[i, 0, :p] = np.asarray(fc_biases[i], np.float32)

    return {
        "wh": jnp.asarray(wh, jnp.bfloat16),     # (N, F, 128) contiguous per head
        "bh": jnp.asarray(bh, jnp.float32),      # (N, 1, 128)
        "wfc": jnp.asarray(wfc, jnp.bfloat16),   # (N, 128, P_pad)
        "bfc": jnp.asarray(bfc, jnp.float32),    # (N, 1, P_pad)
        "param_sizes": tuple(int(p) for p in param_sizes),
        "P_pad": int(P_pad),
    }


def make_metanet_forward(packed, *, min_steps=2):
    """Returns a jitted forward: x (B, 1920) -> list of (B, P_i) f32 arrays."""
    param_sizes = packed["param_sizes"]
    P_pad = packed["P_pad"]
    N = len(param_sizes)
    wh, bh, wfc, bfc = packed["wh"], packed["bh"], packed["wfc"], packed["bfc"]

    def fwd(x):
        B, F = x.shape
        assert F == IN_FEATURES
        B_pad = ((B + 7) // 8) * 8                    # sublane-dense MXU/stores
        hps = _pick_heads_per_step(N, B_pad, P_pad, min_steps=min_steps)
        n_steps = N // hps

        # Pad batch + cast to bf16 ONCE (x is resident across the grid).
        x_bf = jnp.pad(x.astype(jnp.bfloat16), ((0, B_pad - B), (0, 0)))

        out = pl.pallas_call(
            _metanet_kernel,
            out_shape=jax.ShapeDtypeStruct((N, B_pad, P_pad), jnp.float32),
            grid_spec=pltpu.PrefetchScalarGridSpec(
                num_scalar_prefetch=0,
                grid=(n_steps,),
                in_specs=[
                    pl.BlockSpec((B_pad, F), lambda g: (0, 0)),               # x (resident)
                    pl.BlockSpec((hps, F, HIDDEN), lambda g: (g, 0, 0)),      # W_h slab
                    pl.BlockSpec((N, 1, HIDDEN), lambda g: (0, 0, 0)),        # b_h (resident)
                    pl.BlockSpec((hps, HIDDEN, P_pad), lambda g: (g, 0, 0)),  # W_fc heads
                    pl.BlockSpec((N, 1, P_pad), lambda g: (0, 0, 0)),         # b_fc (resident)
                ],
                out_specs=pl.BlockSpec((hps, B_pad, P_pad), lambda g: (g, 0, 0)),
            ),
            compiler_params=pltpu.CompilerParams(
                dimension_semantics=("parallel",),
            ),
        )(x_bf, wh, bh, wfc, bfc)

        # Slice inside the same jit so XLA fuses the unpadding.
        return [out[i, :B, :p] for i, p in enumerate(param_sizes)]

    return jax.jit(fwd)


def metanet_ref_f32(x, w_hidden_t, b_hidden, fc_weights_t, fc_biases, param_sizes):
    hidden = jnp.maximum(x @ w_hidden_t + b_hidden, 0.0)
    outs = []
    for i, p in enumerate(param_sizes):
        h_i = hidden[:, i * HIDDEN:(i + 1) * HIDDEN]
        outs.append(h_i @ fc_weights_t[i] + fc_biases[i])
    return outs


def metanet_ref_bf16(x, w_hidden_t, b_hidden, fc_weights_t, fc_biases, param_sizes):
    """Emulates the kernel's bf16-input / f32-accumulate arithmetic exactly."""
    f32 = lambda a: a.astype(jnp.bfloat16).astype(jnp.float32)
    hidden = jnp.maximum(f32(x) @ f32(w_hidden_t) + b_hidden, 0.0)
    hb = f32(hidden)
    outs = []
    for i, p in enumerate(param_sizes):
        h_i = hb[:, i * HIDDEN:(i + 1) * HIDDEN]
        outs.append(h_i @ f32(fc_weights_t[i]) + fc_biases[i])
    return outs


if __name__ == "__main__":
    key = jax.random.PRNGKey(0)

    # Synthetic param_dict: name -> number of params produced by each fc head.
    param_sizes = [144, 288, 64, 200]
    N = len(param_sizes)

    B = 4  # matches `mean_std_features = torch.rand(4, 1920)`
    keys = jax.random.split(key, 3 + 2 * N)
    x = jax.random.uniform(keys[0], (B, IN_FEATURES), jnp.float32)

    # nn.Linear-style init, pre-transposed to (in, out).
    scale_h = 1.0 / jnp.sqrt(jnp.float32(IN_FEATURES))
    w_hidden_t = jax.random.uniform(keys[1], (IN_FEATURES, HIDDEN * N), jnp.float32,
                                    -scale_h, scale_h)
    b_hidden = jax.random.uniform(keys[2], (HIDDEN * N,), jnp.float32, -scale_h, scale_h)

    scale_fc = 1.0 / jnp.sqrt(jnp.float32(HIDDEN))
    fc_weights_t, fc_biases = [], []
    for i, p in enumerate(param_sizes):
        fc_weights_t.append(jax.random.uniform(keys[3 + 2 * i], (HIDDEN, p), jnp.float32,
                                               -scale_fc, scale_fc))
        fc_biases.append(jax.random.uniform(keys[4 + 2 * i], (p,), jnp.float32,
                                            -scale_fc, scale_fc))

    # One-time parameter packing (host side) + jitted forward.
    packed = pack_metanet_params(w_hidden_t, b_hidden, fc_weights_t, fc_biases, param_sizes)
    metanet_forward = make_metanet_forward(packed)

    outs = metanet_forward(x)
    outs = [jax.block_until_ready(o) for o in outs]

    refs_bf16 = metanet_ref_bf16(x, w_hidden_t, b_hidden, fc_weights_t, fc_biases, param_sizes)
    refs_f32 = metanet_ref_f32(x, w_hidden_t, b_hidden, fc_weights_t, fc_biases, param_sizes)
    for o, rb, rf, p in zip(outs, refs_bf16, refs_f32, param_sizes):
        assert o.shape == (B, p), (o.shape, (B, p))
        # Tight check vs a reference using identical bf16-rounded inputs.
        assert jnp.allclose(o, rb, atol=2e-3, rtol=2e-3), "mismatch vs bf16-emulated reference"
        # Loose check vs the pure-f32 PyTorch-equivalent reference.
        assert jnp.allclose(o, rf, atol=5e-2, rtol=5e-2), "mismatch vs f32 reference"

    print("KERNEL_OK")
</pallas_src>

<mosaic_0001>
module attributes {stable_mosaic.version = 11 : i64} {
  func.func @_metanet_kernel(%arg0: i32, %arg1: memref<8x1920xbf16, #tpu.memory_space<vmem>>, %arg2: memref<2x1920x128xbf16, #tpu.memory_space<vmem>>, %arg3: memref<4x1x128xf32, #tpu.memory_space<vmem>>, %arg4: memref<2x128x384xbf16, #tpu.memory_space<vmem>>, %arg5: memref<4x1x384xf32, #tpu.memory_space<vmem>>, %arg6: memref<2x8x384xf32, #tpu.memory_space<vmem>>) attributes {dimension_semantics = [#tpu.dimension_semantics<parallel>], iteration_bounds = array<i64: 2>, scalar_prefetch = 0 : i64, scratch_operands = 0 : i64, tpu.core_type = #tpu.core_type<tc>, window_params = [{pipeline_mode = #tpu.pipeline_mode<synchronous>, transform_indices = @transform_0, window_bounds = array<i64: 8, 1920>}, {transform_indices = @transform_1, window_bounds = array<i64: 2, 1920, 128>}, {pipeline_mode = #tpu.pipeline_mode<synchronous>, transform_indices = @transform_2, window_bounds = array<i64: 4, 1, 128>}, {transform_indices = @transform_3, window_bounds = array<i64: 2, 128, 384>}, {pipeline_mode = #tpu.pipeline_mode<synchronous>, transform_indices = @transform_4, window_bounds = array<i64: 4, 1, 384>}, {transform_indices = @transform_5, window_bounds = array<i64: 2, 8, 384>}]} {
    %c0 = arith.constant 0 : index
    %c0_0 = arith.constant 0 : index
    %0 = vector.load %arg1[%c0, %c0_0] : memref<8x1920xbf16, #tpu.memory_space<vmem>>, vector<8x1920xbf16>
    %c2_i32 = arith.constant 2 : i32
    %1 = arith.muli %arg0, %c2_i32 : i32
    %c0_i32 = arith.constant 0 : i32
    %2 = arith.addi %1, %c0_i32 : i32
    %c0_1 = arith.constant 0 : index
    %c0_2 = arith.constant 0 : index
    %c0_3 = arith.constant 0 : index
    %3 = vector.load %arg2[%c0_1, %c0_2, %c0_3] : memref<2x1920x128xbf16, #tpu.memory_space<vmem>>, vector<1x1920x128xbf16>
    %4 = vector.shape_cast %3 : vector<1x1920x128xbf16> to vector<1920x128xbf16>
    %cst = arith.constant dense<0.000000e+00> : vector<8x128xf32>
    %5 = tpu.matmul %0, %4, %cst {dimension_numbers = #tpu.dot_dimension_numbers<[1], [0], [0], [1], [0, 0, 1, 1], [], []>} : vector<8x1920xbf16>, vector<1920x128xbf16>, vector<8x128xf32> -> vector<8x128xf32>
    %6 = arith.index_cast %2 : i32 to index
    %c0_4 = arith.constant 0 : index
    %c0_5 = arith.constant 0 : index
    %7 = vector.load %arg3[%6, %c0_4, %c0_5] : memref<4x1x128xf32, #tpu.memory_space<vmem>>, vector<1x1x128xf32>
    %8 = vector.shape_cast %7 : vector<1x1x128xf32> to vector<1x128xf32>
    %9 = vector.broadcast %8 : vector<1x128xf32> to vector<8x128xf32>
    %10 = arith.addf %5, %9 : vector<8x128xf32>
    %cst_6 = arith.constant 0.000000e+00 : f32
    %11 = vector.broadcast %cst_6 : f32 to vector<8x128xf32>
    %12 = arith.maximumf %10, %11 : vector<8x128xf32>
    %13 = arith.truncf %12 : vector<8x128xf32> to vector<8x128xbf16>
    %c0_7 = arith.constant 0 : index
    %c0_8 = arith.constant 0 : index
    %c0_9 = arith.constant 0 : index
    %14 = vector.load %arg4[%c0_7, %c0_8, %c0_9] : memref<2x128x384xbf16, #tpu.memory_space<vmem>>, vector<1x128x384xbf16>
    %15 = vector.shape_cast %14 : vector<1x128x384xbf16> to vector<128x384xbf16>
    %cst_10 = arith.constant dense<0.000000e+00> : vector<8x384xf32>
    %16 = tpu.matmul %13, %15, %cst_10 {dimension_numbers = #tpu.dot_dimension_numbers<[1], [0], [0], [1], [0, 0, 1, 1], [], []>} : vector<8x128xbf16>, vector<128x384xbf16>, vector<8x384xf32> -> vector<8x384xf32>
    %17 = arith.index_cast %2 : i32 to index
    %c0_11 = arith.constant 0 : index
    %c0_12 = arith.constant 0 : index
    %18 = vector.load %arg5[%17, %c0_11, %c0_12] : memref<4x1x384xf32, #tpu.memory_space<vmem>>, vector<1x1x384xf32>
    %19 = vector.shape_cast %18 : vector<1x1x384xf32> to vector<1x384xf32>
    %20 = vector.broadcast %19 : vector<1x384xf32> to vector<8x384xf32>
    %21 = arith.addf %16, %20 : vector<8x384xf32>
    %c0_13 = arith.constant 0 : index
    %c0_14 = arith.constant 0 : index
    %c0_15 = arith.constant 0 : index
    %22 = vector.load %arg6[%c0_13, %c0_14, %c0_15] : memref<2x8x384xf32, #tpu.memory_space<vmem>>, vector<1x8x384xf32>
    %23 = vector.shape_cast %22 : vector<1x8x384xf32> to vector<8x384xf32>
    %24 = vector.shape_cast %21 : vector<8x384xf32> to vector<1x8x384xf32>
    tpu.vector_store %arg6[%c0_13, %c0_14, %c0_15], %24 {strides = array<i32>} : memref<2x8x384xf32, #tpu.memory_space<vmem>>, vector<1x8x384xf32>,
    %c2_i32_16 = arith.constant 2 : i32
    %25 = arith.muli %arg0, %c2_i32_16 : i32
    %c1_i32 = arith.constant 1 : i32
    %26 = arith.addi %25, %c1_i32 : i32
    %c1 = arith.constant 1 : index
    %c0_17 = arith.constant 0 : index
    %c0_18 = arith.constant 0 : index
    %27 = vector.load %arg2[%c1, %c0_17, %c0_18] : memref<2x1920x128xbf16, #tpu.memory_space<vmem>>, vector<1x1920x128xbf16>
    %28 = vector.shape_cast %27 : vector<1x1920x128xbf16> to vector<1920x128xbf16>
    %cst_19 = arith.constant dense<0.000000e+00> : vector<8x128xf32>
    %29 = tpu.matmul %0, %28, %cst_19 {dimension_numbers = #tpu.dot_dimension_numbers<[1], [0], [0], [1], [0, 0, 1, 1], [], []>} : vector<8x1920xbf16>, vector<1920x128xbf16>, vector<8x128xf32> -> vector<8x128xf32>
    %30 = arith.index_cast %26 : i32 to index
    %c0_20 = arith.constant 0 : index
    %c0_21 = arith.constant 0 : index
    %31 = vector.load %arg3[%30, %c0_20, %c0_21] : memref<4x1x128xf32, #tpu.memory_space<vmem>>, vector<1x1x128xf32>
    %32 = vector.shape_cast %31 : vector<1x1x128xf32> to vector<1x128xf32>
    %33 = vector.broadcast %32 : vector<1x128xf32> to vector<8x128xf32>
    %34 = arith.addf %29, %33 : vector<8x128xf32>
    %cst_22 = arith.constant 0.000000e+00 : f32
    %35 = vector.broadcast %cst_22 : f32 to vector<8x128xf32>
    %36 = arith.maximumf %34, %35 : vector<8x128xf32>
    %37 = arith.truncf %36 : vector<8x128xf32> to vector<8x128xbf16>
    %c1_23 = arith.constant 1 : index
    %c0_24 = arith.constant 0 : index
    %c0_25 = arith.constant 0 : index
    %38 = vector.load %arg4[%c1_23, %c0_24, %c0_25] : memref<2x128x384xbf16, #tpu.memory_space<vmem>>, vector<1x128x384xbf16>
    %39 = vector.shape_cast %38 : vector<1x128x384xbf16> to vector<128x384xbf16>
    %cst_26 = arith.constant dense<0.000000e+00> : vector<8x384xf32>
    %40 = tpu.matmul %37, %39, %cst_26 {dimension_numbers = #tpu.dot_dimension_numbers<[1], [0], [0], [1], [0, 0, 1, 1], [], []>} : vector<8x128xbf16>, vector<128x384xbf16>, vector<8x384xf32> -> vector<8x384xf32>
    %41 = arith.index_cast %26 : i32 to index
    %c0_27 = arith.constant 0 : index
    %c0_28 = arith.constant 0 : index
    %42 = vector.load %arg5[%41, %c0_27, %c0_28] : memref<4x1x384xf32, #tpu.memory_space<vmem>>, vector<1x1x384xf32>
    %43 = vector.shape_cast %42 : vector<1x1x384xf32> to vector<1x384xf32>
    %44 = vector.broadcast %43 : vector<1x384xf32> to vector<8x384xf32>
    %45 = arith.addf %40, %44 : vector<8x384xf32>
    %c1_29 = arith.constant 1 : index
    %c0_30 = arith.constant 0 : index
    %c0_31 = arith.constant 0 : index
    %46 = vector.load %arg6[%c1_29, %c0_30, %c0_31] : memref<2x8x384xf32, #tpu.memory_space<vmem>>, vector<1x8x384xf32>
    %47 = vector.shape_cast %46 : vector<1x8x384xf32> to vector<8x384xf32>
    %48 = vector.shape_cast %45 : vector<8x384xf32> to vector<1x8x384xf32>
    tpu.vector_store %arg6[%c1_29, %c0_30, %c0_31], %48 {strides = array<i32>} : memref<2x8x384xf32, #tpu.memory_space<vmem>>, vector<1x8x384xf32>,
    return
  }
  func.func @transform_0(%arg0: i32) -> (i32, i32) {
    %c0_i32 = arith.constant 0 : i32
    %c0_i32_0 = arith.constant 0 : i32
    %c0_i32_1 = arith.constant 0 : i32
    return %c0_i32, %c0_i32_0 : i32, i32
  }
  func.func @transform_1(%arg0: i32) -> (i32, i32, i32) {
    %c0_i32 = arith.constant 0 : i32
    %c0_i32_0 = arith.constant 0 : i32
    %c0_i32_1 = arith.constant 0 : i32
    return %arg0, %c0_i32, %c0_i32_0 : i32, i32, i32
  }
  func.func @transform_2(%arg0: i32) -> (i32, i32, i32) {
    %c0_i32 = arith.constant 0 : i32
    %c0_i32_0 = arith.constant 0 : i32
    %c0_i32_1 = arith.constant 0 : i32
    %c0_i32_2 = arith.constant 0 : i32
    return %c0_i32, %c0_i32_0, %c0_i32_1 : i32, i32, i32
  }
  func.func @transform_3(%arg0: i32) -> (i32, i32, i32) {
    %c0_i32 = arith.constant 0 : i32
    %c0_i32_0 = arith.constant 0 : i32
    %c0_i32_1 = arith.constant 0 : i32
    return %arg0, %c0_i32, %c0_i32_0 : i32, i32, i32
  }
  func.func @transform_4(%arg0: i32) -> (i32, i32, i32) {
    %c0_i32 = arith.constant 0 : i32
    %c0_i32_0 = arith.constant 0 : i32
    %c0_i32_1 = arith.constant 0 : i32
    %c0_i32_2 = arith.constant 0 : i32
    return %c0_i32, %c0_i32_0, %c0_i32_1 : i32, i32, i32
  }
  func.func @transform_5(%arg0: i32) -> (i32, i32, i32) {
    %c0_i32 = arith.constant 0 : i32
    %c0_i32_0 = arith.constant 0 : i32
    %c0_i32_1 = arith.constant 0 : i32
    return %arg0, %c0_i32, %c0_i32_0 : i32, i32, i32
  }
}

</mosaic_0001>

<bundles_post_ra>
// kernel: fwd.1
= control target key start
LH: loop header
LB: loop body
LE: loop exit
PB: predicated region body
PF: predicated region fallthrough
CT: control target
= control target key end

     0   :  { %10 = vsyncpa [#allocation3], 0  ;;  %s5816_s0 = inlined_call_operand.vmem [shape: bf16[8,1920], index: 0, kind: input, shape index: {}]   ;;  %s5817_s1 = inlined_call_operand.hbm [shape: bf16[4,1920,128], index: 1, kind: input, shape index: {}]   ;;  %s5818_s2 = inlined_call_operand.hbm [shape: f32[4,1,128], index: 2, kind: input, shape index: {}]   ;;  %s5819_s3 = inlined_call_operand.vmem [shape: bf16[4,128,384], index: 3, kind: input, shape index: {}]   ;;  %s5820_s4 = inlined_call_operand.hbm [shape: f32[4,1,384], index: 4, kind: input, shape index: {}]   ;;  %s5821_s5 = inlined_call_operand.vmem [shape: f32[4,8,384], index: 5, kind: output, shape index: {}]  }
   0x1   :  { %12 = vsyncpa [#allocation3 + $0x1], 0 }
   0x2   :  { %13 = vsyncpa [#allocation5], 0  ;;  %s5179_s18 = smov 0   ;;  %s5181_s19 = smov 0  }
   0x3   :  { %s5183_s20 = smov 0   ;;  %s5185_s21 = smov 0  }
   0x4 LB: > { %s5198_s22 = sadd.s32 4294967295, %s5135_s21   ;;  %p60_p0 = scmp.ne.s32.totalorder %s5127_s19, %s5123_s18  ;;  %s5135_s21 = sphi %s5185_s21, %s5836_s21   ;;  %s5131_s20 = sphi %s5183_s20, %s5835_s20   ;;  %s5127_s19 = sphi %s5181_s19, %s5834_s19   ;;  %s5123_s18 = sphi %s5179_s18, %s5833_s18  }
   0x5   : > { %p5822_p1 = scmp.eq.s32.totalorder %s5198_s22, 0  ;;  %p3590_p2 = scmp.ge.s32.totalorder %s5135_s21, 1 }
   0x6   : > { %p165_p3 = scmp.lt.s32.totalorder %s5135_s21, 3  ;;  %s5137_s25 = smov [#allocation4]  }
   0x7   : > { %p5206_p4 = por %p5822_p1, %p60_p0  ;;  %s180_s26 = sshll.u32 %s5137_s25, 4  ;;  %s181_s26 = int_to_ptr.vmem [resolvable:$true] %s180_s26 }
   0x8   : > { %p5210_p5 = pnand %p3590_p2, %p165_p3  ;;  %s5138_s28 = smov [#allocation6]  }
   0x9   : > { %s5825_s23 = scalar_select %p5206_p4, 1, 0 }
   0xa   : > { %s5826_s24 = scalar_select %p5210_p5, 1, 0 }
   0xb   : > { %p4632_p6 = pneg %p5210_p5  ;;  %s193_s29 = sshll.u32 %s5138_s28, 4  ;;  %s5222_s29 = int_to_ptr.vmem [resolvable:$true] %s193_s29 }
   0xc   : > { %s5011_s7 = scalar_lea.hbm %s5818_s2, 64 }
   0xd   : > { %p5218_p7 = pnand %p4632_p6, %p5822_p1  ;;  %p5012_p8 = scmp.ne.s32.totalorder %s5818_s2, %s5011_s7 }
   0xe   : > { %p5018_p12 = scmp.lt.u32.totalorder %s5011_s7, %s5818_s2 }
   0xf   : > { %p5013_p9 = pneg %p5218_p7 }
  0x11   : > { %p5014_p10 = pnand %p5013_p9, %p5012_p8 }
  0x13   : > { %p5015_p11 = pneg %p5014_p10 }
  0x15   : > { %p5020_p13 = pnand %p5018_p12, %p5015_p11 }
  0x17   : > { %5023 = shalt.err (!%p5020_p13)
}
  0x18   : > { %s5024_s12 = scalar_lea.vmem %s181_s26, 64  ;;  %p5032_p6 = scmp.lt.s32.totalorder %s181_s26, %s181_s26 }
  0x19   : > { %p5025_p0 = scmp.ne.s32.totalorder %s181_s26, %s5024_s12  ;;  %p5033_p1 = scmp.lt.s32.totalorder %s5024_s12, %s5024_s12 }
  0x1b   : > { %p5027_p2 = pnand %p5025_p0, %p5013_p9  ;;  %p5034_p4 = por %p5033_p1, %p5032_p6 }
  0x1d   : > { %p5028_p3 = pneg %p5027_p2 }
  0x1f   : > { %p5035_p5 = pnand %p5034_p4, %p5028_p3 }
  0x21   : > { %5038 = shalt.err (!%p5035_p5)
}
  0x22   : > { %s5139_s13 = smov 16   ;;  %s5140_s14 = smov 1  }
  0x23   : > { %4635 = dma.hbm_to_vmem [thread:$0]  (!%p5218_p7), %s5818_s2, 64, %s181_s26, [#allocation5], %s5139_s13, %s5139_s13, %s5140_s14  }
  0x24   : > { %s5039_s25 = scalar_lea.hbm %s5820_s4, 192 }
  0x25   : > { %p5040_p8 = scmp.ne.s32.totalorder %s5820_s4, %s5039_s25  ;;  %p5046_p5 = scmp.lt.u32.totalorder %s5039_s25, %s5820_s4 }
  0x27   : > { %p5042_p1 = pnand %p5040_p8, %p5013_p9 }
  0x29   : > { %p5043_p4 = pneg %p5042_p1 }
  0x2b   : > { %p5048_p10 = pnand %p5046_p5, %p5043_p4 }
  0x2d   : > { %5051 = shalt.err (!%p5048_p10)
}
  0x2e   : > { %s5052_s26 = scalar_lea.vmem %s5222_s29, 192  ;;  %p5060_p0 = scmp.lt.s32.totalorder %s5222_s29, %s5222_s29 }
  0x2f   : > { %p5053_p11 = scmp.ne.s32.totalorder %s5222_s29, %s5052_s26  ;;  %p5061_p2 = scmp.lt.s32.totalorder %s5052_s26, %s5052_s26 }
  0x31   : > { %p5055_p12 = pnand %p5053_p11, %p5013_p9  ;;  %p5062_p3 = por %p5061_p2, %p5060_p0 }
  0x33   : > { %p5056_p13 = pneg %p5055_p12 }
  0x35   : > { %p5063_p6 = pnand %p5062_p3, %p5056_p13 }
  0x37   : > { %5066 = shalt.err (!%p5063_p6)
}
  0x38   : > { %s5141_s8 = smov 48   ;;  %s5142_s9 = smov 3  }
  0x39   : > { %4638 = dma.hbm_to_vmem [thread:$0]  (!%p5218_p7), %s5820_s4, 192, %s5222_s29, [#allocation5], %s5141_s8, %s5141_s8, %s5142_s9  }
  0x3a   : > { %s5272_s12 = sadd.s32 1, %s5135_s21   ;;  %s47_s14 = sadd.s32 1, %s5131_s20 }
  0x3b   : > { %s44_s13 = ssub.s32 %s5135_s21, %s5272_s12  ;;  %p54_p8 = scmp.ne.s32.totalorder %s5131_s20, %s5127_s19 }
  0x3c   : > { %p45_p9 = scmp.eq.s32.totalorder %s44_s13, 0  ;;  %p55_p1 = scmp.eq.s32.totalorder %s5135_s21, 0 }
  0x3d   : > { %p4645_p5 = scmp.lt.s32.totalorder %s5135_s21, 2  ;;  %s207_s16 = sand.u32 1, %s5131_s20  }
  0x3e   : > { %s5281_s15 = scalar_select %p45_p9, %s5131_s20, %s47_s14  }
  0x3f   : > { %p56_p4 = por %p55_p1, %p54_p8  ;;  %s4618_s17 = smul.u32 30720, %s5135_s21 }
  0x40   : > { %s4617_s18 = smul.u32 1920, %s207_s16  ;;  %s5297_s21 = scalar_lea.sflag [#allocation3], %s207_s16 }
  0x41   : > { %s5289_s28 = scalar_lea.hbm %s5817_s1, %s4618_s17  ;;  %p5291_p7 = pnand %p4645_p5, %p56_p4 }
  0x42   : > { %s211_s30 = scalar_lea.vmem [#allocation2], %s4617_s18  ;;  %s5067_s7 = scalar_lea.hbm %s5289_s28, 30720 }
  0x43   : > { %s219_s6 = sshll.u32 %s211_s30, 4  ;;  %p5068_p10 = scmp.ne.s32.totalorder %s5289_s28, %s5067_s7  ;;  %s5295_s6 = int_to_ptr.vmem [resolvable:$true] %s219_s6 }
  0x44   : > { %p5069_p11 = pneg %p5291_p7  ;;  %s5072_s9 = scalar_lea.hbm %s5817_s1, 61440 }
  0x45   : > { %p5073_p0 = scmp.lt.u32.totalorder %s5289_s28, %s5817_s1  ;;  %p5074_p2 = scmp.lt.u32.totalorder %s5072_s9, %s5067_s7 }
  0x46   : > { %p5070_p12 = pnand %p5069_p11, %p5068_p10  ;;  %p5076_p6 = scmp.lt.u32.totalorder %s5067_s7, %s5289_s28 }
  0x47   : > { %p5075_p3 = por %p5074_p2, %p5073_p0 }
  0x48   : > { %p5071_p13 = pneg %p5070_p12 }
  0x49   : > { %p5077_p9 = por %p5076_p6, %p5075_p3 }
  0x4b   : > { %p5078_p8 = pnand %p5077_p9, %p5071_p13 }
  0x4d   : > { %5081 = shalt.err (!%p5078_p8)
}
  0x4e   : > { %s5082_s13 = scalar_lea.vmem %s5295_s6, 30720  ;;  %s5143_s14 = smov [#allocation2]  }
  0x4f   : > { %p5083_p1 = scmp.ne.s32.totalorder %s5295_s6, %s5082_s13  ;;  %s5087_s16 = sshll.u32 %s5143_s14, 4  ;;  %s5088_s16 = int_to_ptr.vmem [resolvable:$false] %s5087_s16 }
  0x50   : > { %s5089_s17 = scalar_lea.vmem %s5088_s16, 61440  ;;  %p5090_p10 = scmp.lt.s32.totalorder %s5295_s6, %s5088_s16 }
  0x51   : > { %p5085_p4 = pnand %p5083_p1, %p5069_p11  ;;  %p5091_p12 = scmp.lt.s32.totalorder %s5089_s17, %s5082_s13 }
  0x53   : > { %p5086_p5 = pneg %p5085_p4  ;;  %p5092_p0 = por %p5091_p12, %p5090_p10 }
  0x55   : > { %p5093_p2 = pnand %p5092_p0, %p5086_p5 }
  0x57   : > { %5096 = shalt.err (!%p5093_p2)
}
  0x58   : > { %s5144_s18 = smov 64   ;;  %s5145_s27 = smov 4  }
  0x59   : > { %4642 = dma.hbm_to_vmem [thread:$0]  (!%p5291_p7), %s5289_s28, 30720, %s5295_s6, %s5297_s21, %s5144_s18, %s5144_s18, %s5145_s27  }
  0x5a   : > { %p5829_p11 = scmp.ne.s32.totalorder %s5826_s24, 0 }
  0x5b   : > { %s243_s25 = sand.u32 (!%p5829_p11), 1, %s5127_s19   ;;  %p5830_p13 = scmp.ne.s32.totalorder (!%p5829_p11), %s5825_s23, 0 }
  0x5c   : > { %241 = sbr.rel (%p5829_p11) target bundleno = 1022 (0x3fe), region = 40  ;;  %s244_s7 = scalar_lea.sflag (!%p5829_p11), [#allocation3], %s243_s25 }
  0x5d   : > { %s4619_s30 = smul.u32 (!%p5829_p11), 1920, %s243_s25 }
  0x5f   : > { %s5328_s26 = scalar_lea.vmem (!%p5829_p11), [#allocation2], %s4619_s30 }
  0x63   : > { %5114 = dma.done.wait (%p5830_p13), %s244_s7, 30720  }
  0x64   : > { %5116 = vsyncadd (%p5830_p13), %s244_s7, 4294936576  ;;  %p5831_p3 = scmp.eq.s32.totalorder %s5198_s22, 0 }
  0x66   : > { %5118 = dma.done.wait (%p5831_p3), [#allocation5], 256   ;;  %p5832_p7 = pmov %p5831_p3 }
  0x67   : > { %v4691_v0 = vld [vmem:[%s5328_s26 + $0x40] sm:$0xff]   ;;  %v4695_v4 = vld [vmem:[%s5328_s26 + $0x48] sm:$0xff]   ;;  %v4699_v8 = vld [vmem:[%s5328_s26 + $0x50] sm:$0xff]   ;;  %vm5147_vm0 = vmmov 0   ;;  %s5514_s16 = sshll.u32 %s5198_s22, 1 }
  0x68   : > { %5120 = vsyncadd (%p5832_p7), [#allocation5], 4294967040  ;;  %v4692_v1 = vld [vmem:[%s5328_s26] sm:$0xff]   ;;  %4193 = vmatprep.subr.bf16.mxu0 %v4691_v0  ;;  %v4696_v5 = vld [vmem:[%s5328_s26 + $0x8] sm:$0xff]   ;;  %p291_p6 = scmp.lt.s32.totalorder %s5514_s16, 3  ;;  %s554_s29 = scalar_lea.vmem [#allocation4], %s5514_s16 }
  0x69   : > { %v4693_v2 = vld [vmem:[%s5328_s26 + $0xc0] sm:$0xff]   ;;  %4194 = vmatpush3.bf16.msra.mxu0 %v4692_v1  ;;  %v4697_v6 = vld [vmem:[%s5328_s26 + $0xc8] sm:$0xff]   ;;  %v4700_v9 = vld [vmem:[%s5328_s26 + $0x10] sm:$0xff]  }
  0x6a   : > { %v4694_v3 = vld [vmem:[%s5328_s26 + $0x80] sm:$0xff]   ;;  %4215 = vmatprep.subr.bf16.mxu1 %v4693_v2  ;;  %4195 = vmatprep.subr.bf16.mxu0 %v4695_v4  ;;  %v4698_v7 = vld [vmem:[%s5328_s26 + $0x88] sm:$0xff]   ;;  %v4701_v10 = vld [vmem:[%s5328_s26 + $0xd0] sm:$0xff]   ;;  %s5524_s27 = scalar_select %p291_p6, %s5514_s16, 3 }
  0x6b   : > { %4216 = vmatpush3.bf16.msra.mxu1 %v4694_v3  ;;  %v4702_v11 = vld [vmem:[%s5328_s26 + $0x90] sm:$0xff]   ;;  %v4703_v12 = vld [vmem:[%s5328_s26 + $0x58] sm:$0xff]   ;;  %v4707_v16 = vld [vmem:[%s5328_s26 + $0x60] sm:$0xff]  }
  0x6c   : > { %4217 = vmatprep.subr.bf16.mxu1 %v4697_v6  ;;  %v4704_v13 = vld [vmem:[%s5328_s26 + $0x18] sm:$0xff]   ;;  %v4708_v17 = vld [vmem:[%s5328_s26 + $0x20] sm:$0xff]   ;;  %v4711_v20 = vld [vmem:[%s5328_s26 + $0x68] sm:$0xff]   ;;  %s4620_s25 = smul.u32 192, %s5524_s27 }
  0x6d   : > { %4196 = vmatpush3.bf16.msra.mxu0 %v4696_v5  ;;  %v4705_v14 = vld [vmem:[%s5328_s26 + $0xd8] sm:$0xff]   ;;  %v4709_v18 = vld [vmem:[%s5328_s26 + $0xe0] sm:$0xff]   ;;  %v4712_v21 = vld [vmem:[%s5328_s26 + $0x28] sm:$0xff]   ;;  %s4621_s8 = smul.u32 24, %s5524_s27 }
  0x6e   : > { %4197 = vmatprep.subr.bf16.mxu0 %v4699_v8  ;;  %v4706_v15 = vld [vmem:[%s5328_s26 + $0x98] sm:$0xff]   ;;  %v4710_v19 = vld [vmem:[%s5328_s26 + $0xa0] sm:$0xff]   ;;  %v4713_v22 = vld [vmem:[%s5328_s26 + $0xe8] sm:$0xff]   ;;  %s5538_s23 = scalar_lea.vmem %s5819_s3, %s4620_s25 }
  0x6f   : > { %4218 = vmatpush3.bf16.msra.mxu1 %v4698_v7  ;;  %v4714_v23 = vld [vmem:[%s5328_s26 + $0xa8] sm:$0xff]   ;;  %v4715_v24 = vld [vmem:[%s5328_s26 + $0x70] sm:$0xff]   ;;  %v4719_v28 = vld [vmem:[%s5328_s26 + $0x78] sm:$0xff]   ;;  %s5778_s11 = scalar_lea.vmem %s5821_s5, %s4621_s8 }
  0x70   : > { %4219 = vmatprep.subr.bf16.mxu1 %v4701_v10  ;;  %v4716_v25 = vld [vmem:[%s5328_s26 + $0x30] sm:$0xff]   ;;  %v4720_v29 = vld [vmem:[%s5328_s26 + $0x38] sm:$0xff]   ;;  %v305_v31 = vld [vmem:[%s5816_s0] sm:$0xff] }
  0x71   : > { %4198 = vmatpush3.bf16.msra.mxu0 %v4700_v9  ;;  %v4717_v26 = vld [vmem:[%s5328_s26 + $0xf0] sm:$0xff]   ;;  %v4721_v30 = vld [vmem:[%s5328_s26 + $0xf8] sm:$0xff]   ;;  %v5372_v32 = vcombine.low %v305_v31, %v305_v31  ;;  %v5374_v33 = vcombine.high %v305_v31, %v305_v31  ;;  %v4725_v35 = vld [vmem:[%s5328_s26 + $0x140] sm:$0xff]  }
  0x72   : > { %4199 = vmatprep.subr.bf16.mxu0 %v4703_v12  ;;  %v4718_v27 = vld [vmem:[%s5328_s26 + $0xb0] sm:$0xff]   ;;  %v4724_v34 = vld [vmem:[%s5328_s26 + $0xb8] sm:$0xff]   ;;  %v306_v36 = vld [vmem:[%s5816_s0 + $0x8] sm:$0xff] }
  0x73   : > { %4220 = vmatpush3.bf16.msra.mxu1 %v4702_v11  ;;  %1367 = vmatprep.mubr.bf16.mxu0 %v5374_v33  ;;  %v5382_v37 = vcombine.low %v306_v36, %v306_v36  ;;  %v5384_v38 = vcombine.high %v306_v36, %v306_v36  ;;  %v4728_v39 = vld [vmem:[%s5328_s26 + $0x100] sm:$0xff]   ;;  %v4731_v42 = vld [vmem:[%s5328_s26 + $0x148] sm:$0xff]   ;;  %v4735_v46 = vld [vmem:[%s5328_s26 + $0x150] sm:$0xff]  }
  0x74   : > { %4221 = vmatprep.subr.bf16.mxu1 %v4705_v14  ;;  %v4729_v40 = vld [vmem:[%s5328_s26 + $0x1c0] sm:$0xff]   ;;  %v4732_v43 = vld [vmem:[%s5328_s26 + $0x108] sm:$0xff]   ;;  %v4736_v47 = vld [vmem:[%s5328_s26 + $0x110] sm:$0xff]  }
  0x75   : > { %4200 = vmatpush3.bf16.msra.mxu0 %v4704_v13  ;;  %1407 = vmatprep.mubr.bf16.mxu1 %v5384_v38  ;;  %v4730_v41 = vld [vmem:[%s5328_s26 + $0x180] sm:$0xff]   ;;  %v4733_v44 = vld [vmem:[%s5328_s26 + $0x1c8] sm:$0xff]   ;;  %v4737_v48 = vld [vmem:[%s5328_s26 + $0x1d0] sm:$0xff]  }
  0x76   : > { %4201 = vmatprep.subr.bf16.mxu0 %v4707_v16  ;;  %v4734_v45 = vld [vmem:[%s5328_s26 + $0x188] sm:$0xff]   ;;  %v4738_v49 = vld [vmem:[%s5328_s26 + $0x190] sm:$0xff]   ;;  %v4739_v50 = vld [vmem:[%s5328_s26 + $0x158] sm:$0xff]  }
  0x77   : > { %4222 = vmatpush3.bf16.msra.mxu1 %v4706_v15  ;;  %v4740_v51 = vld [vmem:[%s5328_s26 + $0x118] sm:$0xff]   ;;  %v4743_v54 = vld [vmem:[%s5328_s26 + $0x160] sm:$0xff]   ;;  %v4747_v58 = vld [vmem:[%s5328_s26 + $0x168] sm:$0xff]  }
  0x78   : > { %4223 = vmatprep.subr.bf16.mxu1 %v4709_v18  ;;  %v4741_v52 = vld [vmem:[%s5328_s26 + $0x1d8] sm:$0xff]   ;;  %v4744_v55 = vld [vmem:[%s5328_s26 + $0x120] sm:$0xff]   ;;  %v4748_v59 = vld [vmem:[%s5328_s26 + $0x128] sm:$0xff]  }
  0x79   : > { %4202 = vmatpush3.bf16.msra.mxu0 %v4708_v17  ;;  %v4742_v53 = vld [vmem:[%s5328_s26 + $0x198] sm:$0xff]   ;;  %v4745_v56 = vld [vmem:[%s5328_s26 + $0x1e0] sm:$0xff]   ;;  %v4749_v60 = vld [vmem:[%s5328_s26 + $0x1e8] sm:$0xff]  }
  0x7a   : > { %4203 = vmatprep.subr.bf16.mxu0 %v4711_v20  ;;  %v4746_v57 = vld [vmem:[%s5328_s26 + $0x1a0] sm:$0xff]   ;;  %v4750_v61 = vld [vmem:[%s5328_s26 + $0x1a8] sm:$0xff]   ;;  %v4751_v62 = vld [vmem:[%s5328_s26 + $0x170] sm:$0xff]  }
  0x7b   : > { %4224 = vmatpush3.bf16.msra.mxu1 %v4710_v19  ;;  %v4752_v63 = vld [vmem:[%s5328_s26 + $0x130] sm:$0xff]   ;;  %v4755_v2 = vld [vmem:[%s5328_s26 + $0x178] sm:$0xff]   ;;  %v4761_v9 = vld [vmem:[%s5328_s26 + $0x240] sm:$0xff]  }
  0x7c   : > { %4225 = vmatprep.subr.bf16.mxu1 %v4713_v22  ;;  %v4753_v0 = vld [vmem:[%s5328_s26 + $0x1f0] sm:$0xff]   ;;  %v4756_v3 = vld [vmem:[%s5328_s26 + $0x138] sm:$0xff]   ;;  %v4764_v13 = vld [vmem:[%s5328_s26 + $0x200] sm:$0xff]  }
  0x7d   : > { %4204 = vmatpush3.bf16.msra.mxu0 %v4712_v21  ;;  %v4754_v1 = vld [vmem:[%s5328_s26 + $0x1b0] sm:$0xff]   ;;  %v4757_v4 = vld [vmem:[%s5328_s26 + $0x1f8] sm:$0xff]   ;;  %v4765_v14 = vld [vmem:[%s5328_s26 + $0x2c0] sm:$0xff]  }
  0x7e   : > { %4205 = vmatprep.subr.bf16.mxu0 %v4715_v24  ;;  %v307_v5 = vld [vmem:[%s5816_s0 + $0x10] sm:$0xff]  ;;  %v4760_v8 = vld [vmem:[%s5328_s26 + $0x1b8] sm:$0xff]   ;;  %v4766_v15 = vld [vmem:[%s5328_s26 + $0x280] sm:$0xff]  }
  0x7f   : > { %4226 = vmatpush3.bf16.msra.mxu1 %v4714_v23  ;;  %v5422_v6 = vcombine.low %v307_v5, %v307_v5  ;;  %v5424_v7 = vcombine.high %v307_v5, %v307_v5  ;;  %v308_v10 = vld [vmem:[%s5816_s0 + $0x18] sm:$0xff]  ;;  %v4767_v16 = vld [vmem:[%s5328_s26 + $0x248] sm:$0xff]   ;;  %v4771_v20 = vld [vmem:[%s5328_s26 + $0x250] sm:$0xff]  }
  0x80   : > { %4227 = vmatprep.subr.bf16.mxu1 %v4717_v26  ;;  %v5433_v11 = vcombine.low %v308_v10, %v308_v10  ;;  %v5435_v12 = vcombine.high %v308_v10, %v308_v10  ;;  %v4768_v17 = vld [vmem:[%s5328_s26 + $0x208] sm:$0xff]   ;;  %v4772_v21 = vld [vmem:[%s5328_s26 + $0x210] sm:$0xff]   ;;  %v4775_v24 = vld [vmem:[%s5328_s26 + $0x258] sm:$0xff]  }
  0x81   : > { %4206 = vmatpush3.bf16.msra.mxu0 %v4716_v25  ;;  %v4769_v18 = vld [vmem:[%s5328_s26 + $0x2c8] sm:$0xff]   ;;  %v4773_v22 = vld [vmem:[%s5328_s26 + $0x2d0] sm:$0xff]   ;;  %v4776_v25 = vld [vmem:[%s5328_s26 + $0x218] sm:$0xff]  }
  0x82   : > { %4207 = vmatprep.subr.bf16.mxu0 %v4719_v28  ;;  %v4770_v19 = vld [vmem:[%s5328_s26 + $0x288] sm:$0xff]   ;;  %v4774_v23 = vld [vmem:[%s5328_s26 + $0x290] sm:$0xff]   ;;  %v4777_v26 = vld [vmem:[%s5328_s26 + $0x2d8] sm:$0xff]  }
  0x83   : > { %4228 = vmatpush3.bf16.msra.mxu1 %v4718_v27  ;;  %v4778_v27 = vld [vmem:[%s5328_s26 + $0x298] sm:$0xff]   ;;  %v4779_v28 = vld [vmem:[%s5328_s26 + $0x260] sm:$0xff]   ;;  %v4785_v36 = vld [vmem:[%s5328_s26 + $0x2e8] sm:$0xff]  }
  0x84   : > { %4229 = vmatprep.subr.bf16.mxu1 %v4721_v30  ;;  %v4781_v30 = vld [vmem:[%s5328_s26 + $0x2e0] sm:$0xff]   ;;  %v4814_v5 = vld [vmem:[%s5328_s26 + $0x368] sm:$0xff]   ;;  %v4817_v10 = vld [vmem:[%s5328_s26 + $0x370] sm:$0xff]  }
  0x85   : > { %4208 = vmatpush3.bf16.msra.mxu0 %v4720_v29  ;;  %v4780_v29 = vld [vmem:[%s5328_s26 + $0x220] sm:$0xff]  }
  0x86   : > { %4237 = vmatprep.subr.bf16.mxu0 %v4725_v35  ;;  %v4782_v31 = vld [vmem:[%s5328_s26 + $0x2a0] sm:$0xff]   ;;  %v4784_v35 = vld [vmem:[%s5328_s26 + $0x228] sm:$0xff]  }
  0x87   : > { %4230 = vmatpush3.bf16.msra.mxu1 %v4724_v34  ;;  %v4783_v34 = vld [vmem:[%s5328_s26 + $0x268] sm:$0xff]  }
  0x88   : > { %1368 = vmatmul.mubr.bf16.vlgmr.msra.gmra.mrb[0].mxu0 %v5372_v32  ;;  %4259 = vmatprep.subr.bf16.mxu1 %v4729_v40  ;;  %v4787_v40 = vld [vmem:[%s5328_s26 + $0x270] sm:$0xff]  }
  0x89   : > { %4238 = vmatpush3.bf16.msra.mxu0 %v4728_v39  ;;  %1447 = vmatprep.mubr.bf16.mxu0 %v5424_v7  ;;  %v4786_v39 = vld [vmem:[%s5328_s26 + $0x2a8] sm:$0xff]  }
  0x8a   : > { %1408 = vmatmul.mubr.bf16.vlgmr.msra.gmra.mrb[0].mxu1 %v5382_v37  ;;  %4239 = vmatprep.subr.bf16.mxu0 %v4731_v42  ;;  %v4789_v42 = vld [vmem:[%s5328_s26 + $0x2f0] sm:$0xff]  }
  0x8b   : > { %4260 = vmatpush3.bf16.msra.mxu1 %v4730_v41  ;;  %1487 = vmatprep.mubr.bf16.mxu1 %v5435_v12  ;;  %v4788_v41 = vld [vmem:[%s5328_s26 + $0x230] sm:$0xff]  }
  0x8c   : > { %4261 = vmatprep.subr.bf16.mxu1 %v4733_v44  ;;  %v4791_v44 = vld [vmem:[%s5328_s26 + $0x278] sm:$0xff]  }
  0x8d   : > { %4240 = vmatpush3.bf16.msra.mxu0 %v4732_v43  ;;  %v4790_v43 = vld [vmem:[%s5328_s26 + $0x2b0] sm:$0xff]  }
  0x8e   : > { %4241 = vmatprep.subr.bf16.mxu0 %v4735_v46  ;;  %v4793_v46 = vld [vmem:[%s5328_s26 + $0x2f8] sm:$0xff]  }
  0x8f   : > { %4262 = vmatpush3.bf16.msra.mxu1 %v4734_v45  ;;  %v4792_v45 = vld [vmem:[%s5328_s26 + $0x238] sm:$0xff]  }
  0x90   : > { %4263 = vmatprep.subr.bf16.mxu1 %v4737_v48 }
  0x91   : > { %4242 = vmatpush3.bf16.msra.mxu0 %v4736_v47  ;;  %v309_v47 = vld [vmem:[%s5816_s0 + $0x20] sm:$0xff] }
  0x92   : > { %4243 = vmatprep.subr.bf16.mxu0 %v4739_v50  ;;  %v5472_v48 = vcombine.low %v309_v47, %v309_v47  ;;  %v4796_v50 = vld [vmem:[%s5328_s26 + $0x2b8] sm:$0xff]  }
  0x93   : > { %4264 = vmatpush3.bf16.msra.mxu1 %v4738_v49  ;;  %v5474_v49 = vcombine.high %v309_v47, %v309_v47  ;;  %v4853_v47 = vld [vmem:[%s5538_s23 + $0x98] ss:$12 sps:$4 sm:$0xff]  }
  0x94   : > { %4265 = vmatprep.subr.bf16.mxu1 %v4741_v52  ;;  %v310_v52 = vld [vmem:[%s5816_s0 + $0x28] sm:$0xff] }
  0x95   : > { %4244 = vmatpush3.bf16.msra.mxu0 %v4740_v51  ;;  %v4797_v51 = vld [vmem:[%s5328_s26 + $0x340] sm:$0xff]  }
  0x96   : > { %4245 = vmatprep.subr.bf16.mxu0 %v4743_v54  ;;  %v5484_v54 = vcombine.high %v310_v52, %v310_v52 }
  0x97   : > { %4266 = vmatpush3.bf16.msra.mxu1 %v4742_v53  ;;  %v5482_v53 = vcombine.low %v310_v52, %v310_v52  ;;  %v4857_v52 = vld [vmem:[%s5538_s23 + $0xb0] ss:$12 sps:$4 sm:$0xff]  }
  0x98   : > { %4267 = vmatprep.subr.bf16.mxu1 %v4745_v56  ;;  %v4801_v56 = vld [vmem:[%s5328_s26 + $0x380] sm:$0xff]  }
  0x99   : > { %4246 = vmatpush3.bf16.msra.mxu0 %v4744_v55  ;;  %v4800_v55 = vld [vmem:[%s5328_s26 + $0x300] sm:$0xff]  }
  0x9a   : > { %4247 = vmatprep.subr.bf16.mxu0 %v4747_v58  ;;  %v5146_v58 = vmov 0.0  }
  0x9b   : > { %4268 = vmatpush3.bf16.msra.mxu1 %v4746_v57  ;;  %v4802_v57 = vld [vmem:[%s5328_s26 + $0x348] sm:$0xff]  }
  0x9c   : > { %4269 = vmatprep.subr.bf16.mxu1 %v4749_v60  ;;  %v4804_v60 = vld [vmem:[%s5328_s26 + $0x388] sm:$0xff]  }
  0x9d   : > { %4248 = vmatpush3.bf16.msra.mxu0 %v4748_v59  ;;  %v4803_v59 = vld [vmem:[%s5328_s26 + $0x308] sm:$0xff]  }
  0x9e   : > { %4249 = vmatprep.subr.bf16.mxu0 %v4751_v62  ;;  %v4806_v62 = vld [vmem:[%s5328_s26 + $0x310] sm:$0xff]  }
  0x9f   : > { %4270 = vmatpush3.bf16.msra.mxu1 %v4750_v61  ;;  %v4805_v61 = vld [vmem:[%s5328_s26 + $0x350] sm:$0xff]  }
  0xa0   : > { %4271 = vmatprep.subr.bf16.mxu1 %v4753_v0  ;;  %v4808_v0 = vld [vmem:[%s5328_s26 + $0x358] sm:$0xff]  }
  0xa1   : > { %4250 = vmatpush3.bf16.msra.mxu0 %v4752_v63  ;;  %v4807_v63 = vld [vmem:[%s5328_s26 + $0x390] sm:$0xff]  }
  0xa2   : > { %4251 = vmatprep.subr.bf16.mxu0 %v4755_v2  ;;  %v4811_v2 = vld [vmem:[%s5328_s26 + $0x360] sm:$0xff]  }
  0xa3   : > { %4272 = vmatpush3.bf16.msra.mxu1 %v4754_v1  ;;  %v4809_v1 = vld [vmem:[%s5328_s26 + $0x318] sm:$0xff]  }
  0xa4   : > { %4273 = vmatprep.subr.bf16.mxu1 %v4757_v4  ;;  %v4812_v4 = vld [vmem:[%s5328_s26 + $0x320] sm:$0xff]  }
  0xa5   : > { %4252 = vmatpush3.bf16.msra.mxu0 %v4756_v3  ;;  %v4810_v3 = vld [vmem:[%s5328_s26 + $0x398] sm:$0xff]  }
  0xa6   : > { %4281 = vmatprep.subr.bf16.mxu0 %v4761_v9  ;;  %v4815_v9 = vld [vmem:[%s5328_s26 + $0x328] sm:$0xff]  }
  0xa7   : > { %4274 = vmatpush3.bf16.msra.mxu1 %v4760_v8  ;;  %v4813_v8 = vld [vmem:[%s5328_s26 + $0x3a0] sm:$0xff]  }
  0xa8   : > { %1448 = vmatmul.mubr.bf16.vlgmr.msra.gmra.mrb[4].mxu0 %v5422_v6  ;;  %4303 = vmatprep.subr.bf16.mxu1 %v4765_v14  ;;  %v4818_v14 = vld [vmem:[%s5328_s26 + $0x330] sm:$0xff]  }
  0xa9   : > { %4282 = vmatpush3.bf16.msra.mxu0 %v4764_v13  ;;  %1527 = vmatprep.mubr.bf16.mxu0 %v5474_v49  ;;  %v4816_v13 = vld [vmem:[%s5328_s26 + $0x3a8] sm:$0xff]  }
  0xaa   : > { %1488 = vmatmul.mubr.bf16.vlgmr.msra.gmra.mrb[4].mxu1 %v5433_v11  ;;  %4283 = vmatprep.subr.bf16.mxu0 %v4767_v16  ;;  %v4820_v16 = vld [vmem:[%s5328_s26 + $0x378] sm:$0xff]  }
  0xab   : > { %4304 = vmatpush3.bf16.msra.mxu1 %v4766_v15  ;;  %1567 = vmatprep.mubr.bf16.mxu1 %v5484_v54  ;;  %v311_v15 = vld [vmem:[%s5816_s0 + $0x30] sm:$0xff] }
  0xac   : > { %4305 = vmatprep.subr.bf16.mxu1 %v4769_v18  ;;  %v4819_v18 = vld [vmem:[%s5328_s26 + $0x3b0] sm:$0xff]  }
  0xad   : > { %4284 = vmatpush3.bf16.msra.mxu0 %v4768_v17  ;;  %v5527_v17 = vcombine.high %v311_v15, %v311_v15 }
  0xae   : > { %4285 = vmatprep.subr.bf16.mxu0 %v4771_v20  ;;  %v4824_v20 = vld [vmem:[%s5328_s26 + $0x3b8] sm:$0xff]  }
  0xaf   : > { %4306 = vmatpush3.bf16.msra.mxu1 %v4770_v19  ;;  %v4821_v19 = vld [vmem:[%s5328_s26 + $0x338] sm:$0xff]  }
  0xb0   : > { %4307 = vmatprep.subr.bf16.mxu1 %v4773_v22  ;;  %v4825_v22 = vld [vmem:[%s5816_s0 + $0x38] ss:$0 sps:$4 sm:$0xff]  }
  0xb1   : > { %4286 = vmatpush3.bf16.msra.mxu0 %v4772_v21  ;;  %v5541_v21 = vcombine.low %v311_v15, %v311_v15 }
  0xb2   : > { %4287 = vmatprep.subr.bf16.mxu0 %v4775_v24  ;;  %v4828_v24 = vld [vmem:[%s5538_s23 + $0x4] ss:$12 sps:$4 sm:$0xff]  }
  0xb3   : > { %4308 = vmatpush3.bf16.msra.mxu1 %v4774_v23  ;;  %v4826_v23 = vld [vmem:[%s5538_s23] ss:$12 sps:$4 sm:$0xff]  }
  0xb4   : > { %4309 = vmatprep.subr.bf16.mxu1 %v4777_v26  ;;  %v4832_v26 = vld [vmem:[%s5538_s23 + $0x1c] ss:$12 sps:$4 sm:$0xff]  }
  0xb5   : > { %4288 = vmatpush3.bf16.msra.mxu0 %v4776_v25  ;;  %v4829_v25 = vld [vmem:[%s5538_s23 + $0x8] ss:$12 sps:$4 sm:$0xff]  }
  0xb6   : > { %4289 = vmatprep.subr.bf16.mxu0 %v4779_v28  ;;  %v4830_v28 = vld [vmem:[%s5538_s23 + $0x18] ss:$12 sps:$4 sm:$0xff]  }
  0xb7   : > { %4310 = vmatpush3.bf16.msra.mxu1 %v4778_v27  ;;  %v4833_v27 = vld [vmem:[%s5538_s23 + $0x20] ss:$12 sps:$4 sm:$0xff]  }
  0xb8   : > { %4311 = vmatprep.subr.bf16.mxu1 %v4781_v30  ;;  %v4834_v30 = vld [vmem:[%s5538_s23 + $0x30] ss:$12 sps:$4 sm:$0xff]  }
  0xb9   : > { %4290 = vmatpush3.bf16.msra.mxu0 %v4780_v29  ;;  %v4836_v29 = vld [vmem:[%s5538_s23 + $0x34] ss:$12 sps:$4 sm:$0xff]  }
  0xba   : > { %4291 = vmatprep.subr.bf16.mxu0 %v4783_v34  ;;  %v4840_v34 = vld [vmem:[%s5538_s23 + $0x4c] ss:$12 sps:$4 sm:$0xff]  }
  0xbb   : > { %4312 = vmatpush3.bf16.msra.mxu1 %v4782_v31  ;;  %v4837_v31 = vld [vmem:[%s5538_s23 + $0x38] ss:$12 sps:$4 sm:$0xff]  }
  0xbc   : > { %4313 = vmatprep.subr.bf16.mxu1 %v4785_v36  ;;  %v4838_v36 = vld [vmem:[%s5538_s23 + $0x48] ss:$12 sps:$4 sm:$0xff]  }
  0xbd   : > { %4292 = vmatpush3.bf16.msra.mxu0 %v4784_v35  ;;  %v4841_v35 = vld [vmem:[%s5538_s23 + $0x50] ss:$12 sps:$4 sm:$0xff]  }
  0xbe   : > { %4293 = vmatprep.subr.bf16.mxu0 %v4787_v40  ;;  %v4845_v40 = vld [vmem:[%s5538_s23 + $0x68] ss:$12 sps:$4 sm:$0xff]  }
  0xbf   : > { %4314 = vmatpush3.bf16.msra.mxu1 %v4786_v39  ;;  %v4844_v39 = vld [vmem:[%s5538_s23 + $0x64] ss:$12 sps:$4 sm:$0xff]  }
  0xc0   : > { %4315 = vmatprep.subr.bf16.mxu1 %v4789_v42  ;;  %v4848_v42 = vld [vmem:[%s5538_s23 + $0x7c] ss:$12 sps:$4 sm:$0xff]  }
  0xc1   : > { %4294 = vmatpush3.bf16.msra.mxu0 %v4788_v41  ;;  %v4842_v41 = vld [vmem:[%s5538_s23 + $0x60] ss:$12 sps:$4 sm:$0xff]  }
  0xc2   : > { %4295 = vmatprep.subr.bf16.mxu0 %v4791_v44  ;;  %v4849_v44 = vld [vmem:[%s5538_s23 + $0x80] ss:$12 sps:$4 sm:$0xff]  }
  0xc3   : > { %4316 = vmatpush3.bf16.msra.mxu1 %v4790_v43  ;;  %v4846_v43 = vld [vmem:[%s5538_s23 + $0x78] ss:$12 sps:$4 sm:$0xff]  }
  0xc4   : > { %4317 = vmatprep.subr.bf16.mxu1 %v4793_v46  ;;  %v4850_v46 = vld [vmem:[%s5538_s23 + $0x90] ss:$12 sps:$4 sm:$0xff]  }
  0xc5   : > { %4296 = vmatpush3.bf16.msra.mxu0 %v4792_v45  ;;  %v4852_v45 = vld [vmem:[%s5538_s23 + $0x94] ss:$12 sps:$4 sm:$0xff]  }
  0xc6   : > { %4325 = vmatprep.subr.bf16.mxu0 %v4797_v51  ;;  %v4854_v51 = vld [vmem:[%s5538_s23 + $0xa8] ss:$12 sps:$4 sm:$0xff]  }
  0xc7   : > { %4318 = vmatpush3.bf16.msra.mxu1 %v4796_v50  ;;  %v4856_v50 = vld [vmem:[%s5538_s23 + $0xac] ss:$12 sps:$4 sm:$0xff]  }
  0xc8   : > { %1528 = vmatmul.mubr.bf16.vlgmr.msra.gmra.mrb[8].mxu0 %v5472_v48  ;;  %4537 = vmatprep.subr.bf16.mxu1 %v5146_v58 }
  0xc9   : > { %4326 = vmatpush3.bf16.msra.mxu0 %v4800_v55  ;;  %1607 = vmatprep.mubr.bf16.mxu0 %v5527_v17  ;;  %v4858_v55 = vld [vmem:[%s5328_s26 + $0x400] sm:$0xff]  }
  0xca   : > { %1568 = vmatmul.mubr.bf16.vlgmr.msra.gmra.mrb[8].mxu1 %v5482_v53  ;;  %4327 = vmatprep.subr.bf16.mxu0 %v4802_v57  ;;  %v4860_v57 = vld [vmem:[%s5328_s26 + $0x480] sm:$0xff]  }
  0xcb   : > { %4538 = vmatpush3.bf16.msra.mxu1 %v4801_v56  ;;  %4553 = vmatprep.mubr.msk.bf16.mxu1 %vm5147_vm0, %v5146_v58  ;;  %v5148_v56 = vmov 0  }
  0xcc   : > { %4539 = vmatprep.subr.bf16.mxu1 %v5146_v58 }
  0xcd   : > { %4328 = vmatpush3.bf16.msra.mxu0 %v4803_v59 }
  0xce   : > { %4329 = vmatprep.subr.bf16.mxu0 %v4805_v61 }
  0xcf   : > { %4540 = vmatpush3.bf16.msra.mxu1 %v4804_v60  ;;  %v3605_v60 = vld [vmem:[%s554_s29] ss:$0 sm:$0xff] }
  0xd0   : > { %4541 = vmatprep.subr.bf16.mxu1 %v5146_v58 }
  0xd1   : > { %4330 = vmatpush3.bf16.msra.mxu0 %v4806_v62 }
  0xd2   : > { %4331 = vmatprep.subr.bf16.mxu0 %v4808_v0 }
  0xd3   : > { %4542 = vmatpush3.bf16.msra.mxu1 %v4807_v63 }
  0xd4   : > { %4543 = vmatprep.subr.bf16.mxu1 %v5146_v58 }
  0xd5   : > { %4332 = vmatpush3.bf16.msra.mxu0 %v4809_v1 }
  0xd6   : > { %4333 = vmatprep.subr.bf16.mxu0 %v4811_v2 }
  0xd7   : > { %4544 = vmatpush3.bf16.msra.mxu1 %v4810_v3 }
  0xd8   : > { %4545 = vmatprep.subr.bf16.mxu1 %v5146_v58 }
  0xd9   : > { %4334 = vmatpush3.bf16.msra.mxu0 %v4812_v4 }
  0xda   : > { %4335 = vmatprep.subr.bf16.mxu0 %v4814_v5 }
  0xdb   : > { %4546 = vmatpush3.bf16.msra.mxu1 %v4813_v8 }
  0xdc   : > { %4547 = vmatprep.subr.bf16.mxu1 %v5146_v58 }
  0xdd   : > { %4336 = vmatpush3.bf16.msra.mxu0 %v4815_v9 }
  0xde   : > { %4337 = vmatprep.subr.bf16.mxu0 %v4817_v10 }
  0xdf   : > { %4548 = vmatpush3.bf16.msra.mxu1 %v4816_v13 }
  0xe0   : > { %4549 = vmatprep.subr.bf16.mxu1 %v5146_v58 }
  0xe1   : > { %4338 = vmatpush3.bf16.msra.mxu0 %v4818_v14 }
  0xe2   : > { %4339 = vmatprep.subr.bf16.mxu0 %v4820_v16 }
  0xe3   : > { %4550 = vmatpush3.bf16.msra.mxu1 %v4819_v18 }
  0xe4   : > { %4551 = vmatprep.subr.bf16.mxu1 %v5146_v58 }
  0xe5   : > { %4340 = vmatpush3.bf16.msra.mxu0 %v4821_v19 }
  0xe6   : > { %1836 = vmatprep.subr.bf16.mxu0 %v4828_v24 }
  0xe7   : > { %4552 = vmatpush3.bf16.msra.mxu1 %v4824_v20 }
  0xe8   : > { %1608 = vmatmul.mubr.bf16.vlgmr.msra.gmra.mrb[12].mxu0 %v5541_v21  ;;  %4557 = vmatprep.subr.bf16.mxu1 %v5146_v58 }
  0xe9   : > { %1837 = vmatpush1.bf16.msra.mxu0 %v4826_v23  ;;  %1868 = vmatprep.mubr.bf16.mxu0 %v5148_v56 }
  0xea   : > { %4554 = vmatmul.mubr.bf16.vlgmr.msra.gmra.mrb[12].mxu1 %v4825_v22  ;;  %1838 = vmatprep.subr.bf16.mxu0 %v4832_v26 }
  0xeb   : > { %4573 = vmatprep.mubr.msk.bf16.mxu1 %vm5147_vm0, %v5146_v58  ;;  %4558 = vmatpush3.bf16.msra.mxu1 %v4829_v25 }
  0xec   : > { %4559 = vmatprep.subr.bf16.mxu1 %v5146_v58 }
  0xed   : > { %1839 = vmatpush1.bf16.msra.mxu0 %v4830_v28 }
  0xee   : > { %1840 = vmatprep.subr.bf16.mxu0 %v4836_v29 }
  0xef   : > { %4560 = vmatpush3.bf16.msra.mxu1 %v4833_v27 }
  0xf0   : > { %4561 = vmatprep.subr.bf16.mxu1 %v5146_v58 }
  0xf1   : > { %1841 = vmatpush1.bf16.msra.mxu0 %v4834_v30 }
  0xf2   : > { %1842 = vmatprep.subr.bf16.mxu0 %v4840_v34 }
  0xf3   : > { %4562 = vmatpush3.bf16.msra.mxu1 %v4837_v31 }
  0xf4   : > { %4563 = vmatprep.subr.bf16.mxu1 %v5146_v58 }
  0xf5   : > { %1843 = vmatpush1.bf16.msra.mxu0 %v4838_v36 }
  0xf6   : > { %1844 = vmatprep.subr.bf16.mxu0 %v4844_v39 }
  0xf7   : > { %4564 = vmatpush3.bf16.msra.mxu1 %v4841_v35 }
  0xf8   : > { %4565 = vmatprep.subr.bf16.mxu1 %v5146_v58 }
  0xf9   : > { %1845 = vmatpush1.bf16.msra.mxu0 %v4842_v41 }
  0xfa   : > { %1846 = vmatprep.subr.bf16.mxu0 %v4848_v42 }
  0xfb   : > { %4566 = vmatpush3.bf16.msra.mxu1 %v4845_v40 }
  0xfc   : > { %4567 = vmatprep.subr.bf16.mxu1 %v5146_v58 }
  0xfd   : > { %1847 = vmatpush1.bf16.msra.mxu0 %v4846_v43 }
  0xfe   : > { %1848 = vmatprep.subr.bf16.mxu0 %v4852_v45 }
  0xff   : > { %4568 = vmatpush3.bf16.msra.mxu1 %v4849_v44 }
 0x100   : > { %4569 = vmatprep.subr.bf16.mxu1 %v5146_v58 }
 0x101   : > { %1849 = vmatpush1.bf16.msra.mxu0 %v4850_v46 }
 0x102   : > { %1850 = vmatprep.subr.bf16.mxu0 %v4856_v50 }
 0x103   : > { %4570 = vmatpush3.bf16.msra.mxu1 %v4853_v47 }
 0x104   : > { %4571 = vmatprep.subr.bf16.mxu1 %v5146_v58 }
 0x105   : > { %1851 = vmatpush1.bf16.msra.mxu0 %v4854_v51 }
 0x106   : > { %4365 = vmatprep.subr.bf16.mxu0 %v4858_v55 }
 0x107   : > { %4572 = vmatpush3.bf16.msra.mxu1 %v4857_v52 }
 0x108   : > { %4387 = vmatprep.subr.bf16.mxu1 %v4860_v57 }
 0x15b   : > { %v4209_v59 = vpop.f32.mrb[0].mxu0 }
 0x15c   : > { %v4210_v61 = vpop.f32.mrb[1].mxu0 }
 0x15d   : > { %v4211_v62 = vadd.f32 %v4210_v61, %v4209_v59  ;;  %v4212_v63 = vpop.f32.mrb[2].mxu0  ;;  %v4231_v0 = vpop.f32.mrb[0].mxu1  ;;  %v4861_v61 = vld [vmem:[%s5328_s26 + $0x440] sm:$0xff]  }
 0x15e   : > { %v4213_v1 = vpop.f32.mrb[3].mxu0  ;;  %v4232_v2 = vpop.f32.mrb[1].mxu1  ;;  %v4862_v63 = vld [vmem:[%s5328_s26 + $0x408] sm:$0xff]  }
 0x15f   : > { %v1370_v3 = vadd.f32 %v4211_v62, %v3605_v60  ;;  %v4233_v4 = vadd.f32 %v4232_v2, %v4231_v0  ;;  %v4234_v5 = vpop.f32.mrb[2].mxu1  ;;  %v4859_v60 = vld [vmem:[%s5328_s26 + $0x3c0] sm:$0xff]   ;;  %v4864_v0 = vld [vmem:[%s5328_s26 + $0x488] sm:$0xff]  }
 0x160   : > { %v4235_v8 = vpop.f32.mrb[3].mxu1  ;;  %v4863_v1 = vld [vmem:[%s5328_s26 + $0x3c8] sm:$0xff]   ;;  %v4867_v5 = vld [vmem:[%s5328_s26 + $0x3d0] sm:$0xff]  }
 0x161   : > { %v1410_v9 = vadd.f32 %v4233_v4, %v1370_v3  ;;  %v4865_v2 = vld [vmem:[%s5328_s26 + $0x448] sm:$0xff]   ;;  %v4866_v3 = vld [vmem:[%s5328_s26 + $0x410] sm:$0xff]  }
 0x162   : > { %v4868_v4 = vld [vmem:[%s5328_s26 + $0x490] sm:$0xff]  }
 0x163   : > { %v4869_v8 = vld [vmem:[%s5328_s26 + $0x450] sm:$0xff]  }
 0x17b   : > { %v4253_v10 = vpop.f32.mrb[4].mxu0 }
 0x17c   : > { %v4254_v13 = vpop.f32.mrb[5].mxu0 }
 0x17d   : > { %v4255_v14 = vadd.f32 %v4254_v13, %v4253_v10  ;;  %v4256_v15 = vpop.f32.mrb[6].mxu0  ;;  %v4275_v16 = vpop.f32.mrb[4].mxu1  ;;  %v4872_v10 = vld [vmem:[%s5328_s26 + $0x498] sm:$0xff]  }
 0x17e   : > { %v4257_v18 = vpop.f32.mrb[7].mxu0  ;;  %v4276_v20 = vpop.f32.mrb[5].mxu1  ;;  %v4871_v13 = vld [vmem:[%s5328_s26 + $0x3d8] sm:$0xff]   ;;  %v4875_v15 = vld [vmem:[%s5328_s26 + $0x3e0] sm:$0xff]  }
 0x17f   : > { %v1450_v19 = vadd.f32 %v4255_v14, %v1410_v9  ;;  %v4277_v22 = vadd.f32 %v4276_v20, %v4275_v16  ;;  %v4278_v23 = vpop.f32.mrb[6].mxu1  ;;  %v4870_v9 = vld [vmem:[%s5328_s26 + $0x418] sm:$0xff]   ;;  %v4876_v14 = vld [vmem:[%s5328_s26 + $0x4a0] sm:$0xff]   ;;  %v4878_v18 = vld [vmem:[%s5328_s26 + $0x428] sm:$0xff]  }
 0x180   : > { %v4279_v24 = vpop.f32.mrb[7].mxu1  ;;  %v4877_v16 = vld [vmem:[%s5328_s26 + $0x460] sm:$0xff]   ;;  %v4879_v20 = vld [vmem:[%s5328_s26 + $0x3e8] sm:$0xff]   ;;  %v4882_v23 = vld [vmem:[%s5328_s26 + $0x430] sm:$0xff]  }
 0x181   : > { %v1490_v25 = vadd.f32 %v4277_v22, %v1450_v19  ;;  %v4880_v19 = vld [vmem:[%s5328_s26 + $0x4a8] sm:$0xff]   ;;  %v4884_v24 = vld [vmem:[%s5328_s26 + $0x4b0] sm:$0xff]  }
 0x182   : > { %v4881_v22 = vld [vmem:[%s5328_s26 + $0x468] sm:$0xff]  }
 0x19b   : > { %v4297_v26 = vpop.f32.mrb[8].mxu0 }
 0x19c   : > { %v4298_v27 = vpop.f32.mrb[9].mxu0 }
 0x19d   : > { %v4299_v28 = vadd.f32 %v4298_v27, %v4297_v26  ;;  %v4300_v29 = vpop.f32.mrb[10].mxu0  ;;  %v4319_v30 = vpop.f32.mrb[8].mxu1  ;;  %v4885_v26 = vld [vmem:[%s5328_s26 + $0x470] sm:$0xff]   ;;  %v4886_v27 = vld [vmem:[%s5328_s26 + $0x438] sm:$0xff]  }
 0x19e   : > { %v4301_v31 = vpop.f32.mrb[11].mxu0  ;;  %v4320_v34 = vpop.f32.mrb[9].mxu1  ;;  %v4887_v29 = vld [vmem:[%s5328_s26 + $0x3f8] sm:$0xff]  }
 0x19f   : > { %v1530_v35 = vadd.f32 %v4299_v28, %v1490_v25  ;;  %v4321_v36 = vadd.f32 %v4320_v34, %v4319_v30  ;;  %v4322_v39 = vpop.f32.mrb[10].mxu1  ;;  %v4883_v25 = vld [vmem:[%s5328_s26 + $0x3f0] sm:$0xff]   ;;  %v4888_v28 = vld [vmem:[%s5328_s26 + $0x4b8] sm:$0xff]   ;;  %v4890_v31 = vld [vmem:[%s5328_s26 + $0x500] sm:$0xff]  }
 0x1a0   : > { %v4323_v40 = vpop.f32.mrb[11].mxu1  ;;  %v4889_v30 = vld [vmem:[%s5328_s26 + $0x478] sm:$0xff]   ;;  %v4892_v34 = vld [vmem:[%s5328_s26 + $0x580] sm:$0xff]   ;;  %v4894_v39 = vld [vmem:[%s5328_s26 + $0x508] sm:$0xff]  }
 0x1a1   : > { %v1570_v41 = vadd.f32 %v4321_v36, %v1530_v35  ;;  %v4891_v35 = vld [vmem:[%s5328_s26 + $0x4c0] sm:$0xff]   ;;  %v4896_v40 = vld [vmem:[%s5328_s26 + $0x588] sm:$0xff]  }
 0x1a2   : > { %v4893_v36 = vld [vmem:[%s5328_s26 + $0x540] sm:$0xff]  }
 0x1bb   : > { %v4341_v42 = vpop.f32.mrb[12].mxu0 }
 0x1bc   : > { %v4342_v43 = vpop.f32.mrb[13].mxu0 }
 0x1bd   : > { %v4343_v44 = vadd.f32 %v4342_v43, %v4341_v42  ;;  %v4344_v45 = vpop.f32.mrb[14].mxu0  ;;  %v1649_v46 = vpop.f32.mrb[12].mxu1  ;;  %v4897_v42 = vld [vmem:[%s5328_s26 + $0x548] sm:$0xff]   ;;  %v4898_v43 = vld [vmem:[%s5328_s26 + $0x510] sm:$0xff]  }
 0x1be   : > { %v4345_v47 = vpop.f32.mrb[15].mxu0  ;;  %v4555_v50 = vpop.f32.mrb[13].mxu1  ;;  %v4902_v45 = vld [vmem:[%s5328_s26 + $0x518] sm:$0xff]  }
 0x1bf   : > { %v1610_v51 = vadd.f32 %v4343_v44, %v1570_v41  ;;  %v1652_v52 = vpop.f32.mrb[14].mxu1  ;;  %v4895_v41 = vld [vmem:[%s5328_s26 + $0x4c8] sm:$0xff]   ;;  %v4900_v44 = vld [vmem:[%s5328_s26 + $0x590] sm:$0xff]   ;;  %v4903_v47 = vld [vmem:[%s5328_s26 + $0x4d8] sm:$0xff]  }
 0x1c0   : > { %v4556_v55 = vpop.f32.mrb[15].mxu1  ;;  %v4908_v50 = vld [vmem:[%s5328_s26 + $0x5a0] sm:$0xff]  }
 0x1c1   : > { %v1650_v57 = vadd.f32 %v1649_v46, %v1610_v51  ;;  %v4904_v46 = vld [vmem:[%s5328_s26 + $0x598] sm:$0xff]   ;;  %v4907_v51 = vld [vmem:[%s5328_s26 + $0x4e0] sm:$0xff]   ;;  %v4910_v55 = vld [vmem:[%s5328_s26 + $0x528] sm:$0xff]  }
 0x1c2   : > { %v4909_v52 = vld [vmem:[%s5328_s26 + $0x560] sm:$0xff]  }
 0x1c3   : > { %v1655_v59 = vmax.f32 %v1650_v57, 0.0  ;;  %v4912_v57 = vld [vmem:[%s5328_s26 + $0x5a8] sm:$0xff]  }
 0x1c5   : > { %v1656_v62 = vpack.c.bf16 %v1655_v59, %v1655_v59  ;;  %v4911_v59 = vld [vmem:[%s5328_s26 + $0x4e8] sm:$0xff]  }
 0x1c7   : > { %1869 = vmatmul.mubr.bf16.vlgmr.msra.gmra.mrb[16].mxu0 %v1656_v62  ;;  %4574 = vmatmul.mubr.bf16.vlgmr.msra.gmra.mrb[16].mxu1 %v1656_v62  ;;  %v4916_v62 = vld [vmem:[%s5328_s26 + $0x5b0] sm:$0xff]  }
 0x1c8   : > { %4366 = vmatpush3.bf16.msra.mxu0 %v4859_v60  ;;  %4388 = vmatpush3.bf16.msra.mxu1 %v4861_v61  ;;  %v4913_v60 = vld [vmem:[%s5328_s26 + $0x568] sm:$0xff]   ;;  %v4914_v61 = vld [vmem:[%s5328_s26 + $0x530] sm:$0xff]  }
 0x1c9   : > { %4367 = vmatprep.subr.bf16.mxu0 %v4862_v63  ;;  %4389 = vmatprep.subr.bf16.mxu1 %v4864_v0  ;;  %v4915_v63 = vld [vmem:[%s5328_s26 + $0x4f0] sm:$0xff]  }
 0x1ca   : > { %2922 = vmatprep.mubr.bf16.mxu0 %v5374_v33  ;;  %2962 = vmatprep.mubr.bf16.mxu1 %v5384_v38  ;;  %v4873_v33 = vld [vmem:[%s5328_s26 + $0x458] sm:$0xff]   ;;  %v4874_v38 = vld [vmem:[%s5328_s26 + $0x420] sm:$0xff]   ;;  %v4917_v0 = vld [vmem:[%s5328_s26 + $0x570] sm:$0xff]  }
 0x1cc   : > { %4368 = vmatpush3.bf16.msra.mxu0 %v4863_v1  ;;  %4390 = vmatpush3.bf16.msra.mxu1 %v4865_v2  ;;  %v4918_v1 = vld [vmem:[%s5328_s26 + $0x538] sm:$0xff]  }
 0x1cd   : > { %4369 = vmatprep.subr.bf16.mxu0 %v4866_v3  ;;  %4391 = vmatprep.subr.bf16.mxu1 %v4868_v4  ;;  %v4920_v2 = vld [vmem:[%s5328_s26 + $0x5b8] sm:$0xff]  }
 0x1ce   : > { %v4919_v3 = vld [vmem:[%s5328_s26 + $0x4f8] sm:$0xff]  }
 0x1cf   : > { %v4921_v4 = vld [vmem:[%s5328_s26 + $0x578] sm:$0xff]  }
 0x1d0   : > { %4370 = vmatpush3.bf16.msra.mxu0 %v4867_v5  ;;  %4392 = vmatpush3.bf16.msra.mxu1 %v4869_v8  ;;  %v4922_v5 = vld [vmem:[%s5328_s26 + $0x600] sm:$0xff]  }
 0x1d1   : > { %4371 = vmatprep.subr.bf16.mxu0 %v4870_v9  ;;  %4393 = vmatprep.subr.bf16.mxu1 %v4872_v10  ;;  %v4924_v8 = vld [vmem:[%s5328_s26 + $0x680] sm:$0xff]  }
 0x1d2   : > { %v4923_v9 = vld [vmem:[%s5328_s26 + $0x5c0] sm:$0xff]  }
 0x1d3   : > { %v4925_v10 = vld [vmem:[%s5328_s26 + $0x640] sm:$0xff]  }
 0x1d4   : > { %4372 = vmatpush3.bf16.msra.mxu0 %v4871_v13  ;;  %4394 = vmatpush3.bf16.msra.mxu1 %v4873_v33  ;;  %v4926_v13 = vld [vmem:[%s5328_s26 + $0x608] sm:$0xff]  }
 0x1d5   : > { %4373 = vmatprep.subr.bf16.mxu0 %v4874_v38  ;;  %4395 = vmatprep.subr.bf16.mxu1 %v4876_v14  ;;  %v4928_v33 = vld [vmem:[%s5328_s26 + $0x688] sm:$0xff]  }
 0x1d6   : > { %v4927_v38 = vld [vmem:[%s5328_s26 + $0x5c8] sm:$0xff]  }
 0x1d7   : > { %v4929_v14 = vld [vmem:[%s5328_s26 + $0x648] sm:$0xff]  }
 0x1d8   : > { %4374 = vmatpush3.bf16.msra.mxu0 %v4875_v15  ;;  %4396 = vmatpush3.bf16.msra.mxu1 %v4877_v16  ;;  %v4930_v15 = vld [vmem:[%s5328_s26 + $0x610] sm:$0xff]  }
 0x1d9   : > { %4375 = vmatprep.subr.bf16.mxu0 %v4878_v18  ;;  %4397 = vmatprep.subr.bf16.mxu1 %v4880_v19  ;;  %v4932_v16 = vld [vmem:[%s5328_s26 + $0x690] sm:$0xff]   ;;  %v4934_v18 = vld [vmem:[%s5328_s26 + $0x618] sm:$0xff]  }
 0x1da   : > { %v4936_v19 = vld [vmem:[%s5328_s26 + $0x698] sm:$0xff]  }
 0x1dc   : > { %4376 = vmatpush3.bf16.msra.mxu0 %v4879_v20  ;;  %4398 = vmatpush3.bf16.msra.mxu1 %v4881_v22  ;;  %v4935_v20 = vld [vmem:[%s5328_s26 + $0x5d8] sm:$0xff]   ;;  %v4940_v22 = vld [vmem:[%s5328_s26 + $0x6a0] sm:$0xff]  }
 0x1dd   : > { %4377 = vmatprep.subr.bf16.mxu0 %v4882_v23  ;;  %4399 = vmatprep.subr.bf16.mxu1 %v4884_v24  ;;  %v4939_v23 = vld [vmem:[%s5328_s26 + $0x5e0] sm:$0xff]  }
 0x1de   : > { %v4941_v24 = vld [vmem:[%s5328_s26 + $0x660] sm:$0xff]  }
 0x1e0   : > { %4378 = vmatpush3.bf16.msra.mxu0 %v4883_v25  ;;  %4400 = vmatpush3.bf16.msra.mxu1 %v4885_v26  ;;  %v4942_v25 = vld [vmem:[%s5328_s26 + $0x628] sm:$0xff]  }
 0x1e1   : > { %4379 = vmatprep.subr.bf16.mxu0 %v4886_v27  ;;  %4401 = vmatprep.subr.bf16.mxu1 %v4888_v28  ;;  %v4944_v26 = vld [vmem:[%s5328_s26 + $0x6a8] sm:$0xff]  }
 0x1e2   : > { %v4943_v27 = vld [vmem:[%s5328_s26 + $0x5e8] sm:$0xff]  }
 0x1e3   : > { %v4945_v28 = vld [vmem:[%s5328_s26 + $0x668] sm:$0xff]  }
 0x1e4   : > { %4380 = vmatpush3.bf16.msra.mxu0 %v4887_v29  ;;  %4402 = vmatpush3.bf16.msra.mxu1 %v4889_v30  ;;  %v4946_v29 = vld [vmem:[%s5328_s26 + $0x630] sm:$0xff]  }
 0x1e5   : > { %4409 = vmatprep.subr.bf16.mxu0 %v4890_v31  ;;  %4431 = vmatprep.subr.bf16.mxu1 %v4892_v34  ;;  %v4948_v30 = vld [vmem:[%s5328_s26 + $0x6b0] sm:$0xff]  }
 0x1e6   : > { %v4947_v31 = vld [vmem:[%s5328_s26 + $0x5f0] sm:$0xff]  }
 0x1e7   : > { %2923 = vmatmul.mubr.bf16.vlgmr.msra.gmra.mrb[20].mxu0 %v5372_v32  ;;  %2963 = vmatmul.mubr.bf16.vlgmr.msra.gmra.mrb[20].mxu1 %v5382_v37  ;;  %v4899_v32 = vld [vmem:[%s5328_s26 + $0x4d0] sm:$0xff]  }
 0x1e8   : > { %4410 = vmatpush3.bf16.msra.mxu0 %v4891_v35  ;;  %4432 = vmatpush3.bf16.msra.mxu1 %v4893_v36  ;;  %v4901_v37 = vld [vmem:[%s5328_s26 + $0x550] sm:$0xff]   ;;  %v4950_v35 = vld [vmem:[%s5328_s26 + $0x638] sm:$0xff]  }
 0x1e9   : > { %4411 = vmatprep.subr.bf16.mxu0 %v4894_v39  ;;  %4433 = vmatprep.subr.bf16.mxu1 %v4896_v40  ;;  %v4949_v34 = vld [vmem:[%s5328_s26 + $0x670] sm:$0xff]   ;;  %v4952_v36 = vld [vmem:[%s5328_s26 + $0x6b8] sm:$0xff]  }
 0x1ea   : > { %3002 = vmatprep.mubr.bf16.mxu0 %v5424_v7  ;;  %3042 = vmatprep.mubr.bf16.mxu1 %v5435_v12  ;;  %v4905_v7 = vld [vmem:[%s5328_s26 + $0x558] sm:$0xff]   ;;  %v4906_v12 = vld [vmem:[%s5328_s26 + $0x520] sm:$0xff]  }
 0x1eb   : > { %v4951_v39 = vld [vmem:[%s5328_s26 + $0x5f8] sm:$0xff]  }
 0x1ec   : > { %4412 = vmatpush3.bf16.msra.mxu0 %v4895_v41  ;;  %4434 = vmatpush3.bf16.msra.mxu1 %v4897_v42  ;;  %v4953_v40 = vld [vmem:[%s5328_s26 + $0x678] sm:$0xff]   ;;  %v4954_v41 = vld [vmem:[%s5328_s26 + $0x700] sm:$0xff]  }
 0x1ed   : > { %4413 = vmatprep.subr.bf16.mxu0 %v4898_v43  ;;  %4435 = vmatprep.subr.bf16.mxu1 %v4900_v44  ;;  %v4955_v42 = vld [vmem:[%s5328_s26 + $0x6c0] sm:$0xff]   ;;  %v4957_v44 = vld [vmem:[%s5328_s26 + $0x708] sm:$0xff]  }
 0x1ee   : > { %v4956_v43 = vld [vmem:[%s5328_s26 + $0x740] sm:$0xff]  }
 0x1f0   : > { %4414 = vmatpush3.bf16.msra.mxu0 %v4899_v32  ;;  %4436 = vmatpush3.bf16.msra.mxu1 %v4901_v37  ;;  %v4958_v32 = vld [vmem:[%s5328_s26 + $0x6c8] sm:$0xff]  }
 0x1f1   : > { %4415 = vmatprep.subr.bf16.mxu0 %v4902_v45  ;;  %4437 = vmatprep.subr.bf16.mxu1 %v4904_v46  ;;  %v4959_v37 = vld [vmem:[%s5328_s26 + $0x748] sm:$0xff]   ;;  %v4960_v45 = vld [vmem:[%s5328_s26 + $0x710] sm:$0xff]   ;;  %v4963_v46 = vld [vmem:[%s5328_s26 + $0x718] sm:$0xff]  }
 0x1f4   : > { %4416 = vmatpush3.bf16.msra.mxu0 %v4903_v47  ;;  %4438 = vmatpush3.bf16.msra.mxu1 %v4905_v7  ;;  %v4964_v47 = vld [vmem:[%s5328_s26 + $0x6d8] sm:$0xff]   ;;  %v4966_v7 = vld [vmem:[%s5328_s26 + $0x720] sm:$0xff]  }
 0x1f5   : > { %4417 = vmatprep.subr.bf16.mxu0 %v4906_v12  ;;  %4439 = vmatprep.subr.bf16.mxu1 %v4908_v50  ;;  %v4967_v12 = vld [vmem:[%s5328_s26 + $0x6e0] sm:$0xff]  }
 0x1f6   : > { %v4968_v50 = vld [vmem:[%s5328_s26 + $0x760] sm:$0xff]  }
 0x1f8   : > { %4418 = vmatpush3.bf16.msra.mxu0 %v4907_v51  ;;  %4440 = vmatpush3.bf16.msra.mxu1 %v4909_v52  ;;  %v4969_v51 = vld [vmem:[%s5328_s26 + $0x728] sm:$0xff]  }
 0x1f9   : > { %4419 = vmatprep.subr.bf16.mxu0 %v4910_v55  ;;  %4441 = vmatprep.subr.bf16.mxu1 %v4912_v57  ;;  %v4970_v52 = vld [vmem:[%s5328_s26 + $0x6e8] sm:$0xff]   ;;  %v4972_v57 = vld [vmem:[%s5328_s26 + $0x730] sm:$0xff]  }
 0x1fa   : > { %v4971_v55 = vld [vmem:[%s5328_s26 + $0x768] sm:$0xff]  }
 0x1fc   : > { %4420 = vmatpush3.bf16.msra.mxu0 %v4911_v59  ;;  %4442 = vmatpush3.bf16.msra.mxu1 %v4913_v60  ;;  %v4973_v59 = vld [vmem:[%s5328_s26 + $0x6f0] sm:$0xff]  }
 0x1fd   : > { %4421 = vmatprep.subr.bf16.mxu0 %v4914_v61  ;;  %4443 = vmatprep.subr.bf16.mxu1 %v4916_v62  ;;  %v4974_v60 = vld [vmem:[%s5328_s26 + $0x770] sm:$0xff]   ;;  %v4975_v61 = vld [vmem:[%s5328_s26 + $0x738] sm:$0xff]  }
 0x1fe   : > { %v4976_v62 = vld [vmem:[%s5328_s26 + $0x6f8] sm:$0xff]  }
 0x200   : > { %4422 = vmatpush3.bf16.msra.mxu0 %v4915_v63  ;;  %4444 = vmatpush3.bf16.msra.mxu1 %v4917_v0  ;;  %v4977_v63 = vld [vmem:[%s5328_s26 + $0x778] sm:$0xff]  }
 0x201   : > { %4423 = vmatprep.subr.bf16.mxu0 %v4918_v1  ;;  %4445 = vmatprep.subr.bf16.mxu1 %v4920_v2  ;;  %v5010_v0 = vld [vmem:[%s5816_s0 + $0x38] ss:$0 sps:$4 sm:$0xff]   ;;  %v4978_v1 = vld [vmem:[%s5538_s23 + $0xc0] ss:$12 sps:$4 sm:$0xff]   ;;  %v4980_v2 = vld [vmem:[%s5538_s23 + $0xc4] ss:$12 sps:$4 sm:$0xff]  }
 0x204   : > { %4424 = vmatpush3.bf16.msra.mxu0 %v4919_v3  ;;  %4446 = vmatpush3.bf16.msra.mxu1 %v4921_v4  ;;  %v4981_v3 = vld [vmem:[%s5538_s23 + $0xc8] ss:$12 sps:$4 sm:$0xff]  }
 0x205   : > { %4453 = vmatprep.subr.bf16.mxu0 %v4922_v5  ;;  %4475 = vmatprep.subr.bf16.mxu1 %v4924_v8  ;;  %v4984_v4 = vld [vmem:[%s5538_s23 + $0xdc] ss:$12 sps:$4 sm:$0xff]   ;;  %v4982_v5 = vld [vmem:[%s5538_s23 + $0xd8] ss:$12 sps:$4 sm:$0xff]  }
 0x206   : > { %v4989_v8 = vld [vmem:[%s5538_s23 + $0xf8] ss:$12 sps:$4 sm:$0xff]  }
 0x207   : > { %3003 = vmatmul.mubr.bf16.vlgmr.msra.gmra.mrb[24].mxu0 %v5422_v6  ;;  %3043 = vmatmul.mubr.bf16.vlgmr.msra.gmra.mrb[24].mxu1 %v5433_v11  ;;  %v4931_v6 = vld [vmem:[%s5328_s26 + $0x5d0] sm:$0xff]  }
 0x208   : > { %4454 = vmatpush3.bf16.msra.mxu0 %v4923_v9  ;;  %4476 = vmatpush3.bf16.msra.mxu1 %v4925_v10  ;;  %v4933_v11 = vld [vmem:[%s5328_s26 + $0x650] sm:$0xff]   ;;  %v4992_v10 = vld [vmem:[%s5538_s23 + $0x10c] ss:$12 sps:$4 sm:$0xff]  }
 0x209   : > { %4455 = vmatprep.subr.bf16.mxu0 %v4926_v13  ;;  %4477 = vmatprep.subr.bf16.mxu1 %v4928_v33  ;;  %v4986_v9 = vld [vmem:[%s5538_s23 + $0xf0] ss:$12 sps:$4 sm:$0xff]   ;;  %v1693_v33 = vlaneseq }
 0x20a   : > { %3082 = vmatprep.mubr.bf16.mxu0 %v5474_v49  ;;  %3122 = vmatprep.mubr.bf16.mxu1 %v5484_v54  ;;  %v4937_v49 = vld [vmem:[%s5328_s26 + $0x658] sm:$0xff]   ;;  %v4938_v54 = vld [vmem:[%s5328_s26 + $0x620] sm:$0xff]  }
 0x20b   : > { %v4993_v13 = vld [vmem:[%s5538_s23 + $0x110] ss:$12 sps:$4 sm:$0xff]  }
 0x20c   : > { %4456 = vmatpush3.bf16.msra.mxu0 %v4927_v38  ;;  %4478 = vmatpush3.bf16.msra.mxu1 %v4929_v14  ;;  %v4990_v38 = vld [vmem:[%s5538_s23 + $0x108] ss:$12 sps:$4 sm:$0xff]   ;;  %v4996_v14 = vld [vmem:[%s5538_s23 + $0x124] ss:$12 sps:$4 sm:$0xff]  }
 0x20d   : > { %4457 = vmatprep.subr.bf16.mxu0 %v4930_v15  ;;  %4479 = vmatprep.subr.bf16.mxu1 %v4932_v16  ;;  %v4997_v15 = vld [vmem:[%s5538_s23 + $0x128] ss:$12 sps:$4 sm:$0xff]   ;;  %v5754_v16 = vshrl.u32 %v1693_v33, 7 }
 0x210   : > { %4458 = vmatpush3.bf16.msra.mxu0 %v4931_v6  ;;  %4480 = vmatpush3.bf16.msra.mxu1 %v4933_v11  ;;  %v4994_v6 = vld [vmem:[%s5538_s23 + $0x120] ss:$12 sps:$4 sm:$0xff]   ;;  %v1695_v11 = vsub.s32 0, %v5754_v16 }
 0x211   : > { %4459 = vmatprep.subr.bf16.mxu0 %v4934_v18  ;;  %4481 = vmatprep.subr.bf16.mxu1 %v4936_v19  ;;  %v1703_v18 = vsub.s32 2, %v5754_v16 }
 0x214   : > { %4460 = vmatpush3.bf16.msra.mxu0 %v4935_v20  ;;  %4482 = vmatpush3.bf16.msra.mxu1 %v4937_v49  ;;  %v1699_v20 = vsub.s32 1, %v5754_v16 }
 0x215   : > { %4461 = vmatprep.subr.bf16.mxu0 %v4938_v54  ;;  %4483 = vmatprep.subr.bf16.mxu1 %v4940_v22 }
 0x218   : > { %4462 = vmatpush3.bf16.msra.mxu0 %v4939_v23  ;;  %4484 = vmatpush3.bf16.msra.mxu1 %v4941_v24  ;;  %v5000_v23 = vld [vmem:[%s5538_s23 + $0x13c] ss:$12 sps:$4 sm:$0xff]   ;;  %v4998_v24 = vld [vmem:[%s5538_s23 + $0x138] ss:$12 sps:$4 sm:$0xff]  }
 0x219   : > { %4463 = vmatprep.subr.bf16.mxu0 %v4942_v25  ;;  %4485 = vmatprep.subr.bf16.mxu1 %v4944_v26  ;;  %v5001_v25 = vld [vmem:[%s5538_s23 + $0x140] ss:$12 sps:$4 sm:$0xff]  }
 0x21c   : > { %4464 = vmatpush3.bf16.msra.mxu0 %v4943_v27  ;;  %4486 = vmatpush3.bf16.msra.mxu1 %v4945_v28 }
 0x21d   : > { %4465 = vmatprep.subr.bf16.mxu0 %v4946_v29  ;;  %4487 = vmatprep.subr.bf16.mxu1 %v4948_v30 }
 0x220   : > { %4466 = vmatpush3.bf16.msra.mxu0 %v4947_v31  ;;  %4488 = vmatpush3.bf16.msra.mxu1 %v4949_v34 }
 0x221   : > { %4467 = vmatprep.subr.bf16.mxu0 %v4950_v35  ;;  %4489 = vmatprep.subr.bf16.mxu1 %v4952_v36 }
 0x224   : > { %4468 = vmatpush3.bf16.msra.mxu0 %v4951_v39  ;;  %4490 = vmatpush3.bf16.msra.mxu1 %v4953_v40  ;;  %v5004_v39 = vld [vmem:[%s5538_s23 + $0x154] ss:$12 sps:$4 sm:$0xff]  }
 0x225   : > { %4497 = vmatprep.subr.bf16.mxu0 %v4954_v41  ;;  %4577 = vmatprep.subr.bf16.mxu1 %v5146_v58 }
 0x227   : > { %3083 = vmatmul.mubr.bf16.vlgmr.msra.gmra.mrb[28].mxu0 %v5472_v48  ;;  %3123 = vmatmul.mubr.bf16.vlgmr.msra.gmra.mrb[28].mxu1 %v5482_v53  ;;  %v4961_v48 = vld [vmem:[%s5328_s26 + $0x6d0] sm:$0xff]  }
 0x228   : > { %4498 = vmatpush3.bf16.msra.mxu0 %v4955_v42  ;;  %4578 = vmatpush3.bf16.msra.mxu1 %v4956_v43  ;;  %v4962_v53 = vld [vmem:[%s5328_s26 + $0x750] sm:$0xff]   ;;  %v5005_v43 = vld [vmem:[%s5538_s23 + $0x158] ss:$12 sps:$4 sm:$0xff]  }
 0x229   : > { %4499 = vmatprep.subr.bf16.mxu0 %v4957_v44  ;;  %4579 = vmatprep.subr.bf16.mxu1 %v5146_v58  ;;  %v5002_v42 = vld [vmem:[%s5538_s23 + $0x150] ss:$12 sps:$4 sm:$0xff]   ;;  %v5008_v44 = vld [vmem:[%s5538_s23 + $0x16c] ss:$12 sps:$4 sm:$0xff]  }
 0x22a   : > { %3162 = vmatprep.mubr.bf16.mxu0 %v5527_v17  ;;  %4593 = vmatprep.mubr.msk.bf16.mxu1 %vm5147_vm0, %v5146_v58  ;;  %v4965_v17 = vld [vmem:[%s5328_s26 + $0x758] sm:$0xff]   ;;  %s3741_s26 = smul.u32 6, %s5198_s22 }
 0x22c   : > { %4500 = vmatpush3.bf16.msra.mxu0 %v4958_v32  ;;  %4580 = vmatpush3.bf16.msra.mxu1 %v4959_v37  ;;  %s5761_s22 = scalar_lea.vmem [#allocation6], %s3741_s26  ;;  %v5006_v32 = vld [vmem:[%s5538_s23 + $0x168] ss:$12 sps:$4 sm:$0xff]   ;;  %v5009_v37 = vld [vmem:[%s5538_s23 + $0x170] ss:$12 sps:$4 sm:$0xff]  }
 0x22d   : > { %4501 = vmatprep.subr.bf16.mxu0 %v4960_v45  ;;  %4581 = vmatprep.subr.bf16.mxu1 %v5146_v58  ;;  %v1691_v19 = vld [vmem:[%s5761_s22] sm:$0x7] }
 0x22e   : > { %v1696_v49 = vrot.slane %v1691_v19, %v1695_v11  ;;  %v1704_v54 = vrot.slane %v1691_v19, %v1703_v18  ;;  %v1700_v22 = vrot.slane %v1691_v19, %v1699_v20 }
 0x230   : > { %4502 = vmatpush3.bf16.msra.mxu0 %v4961_v48  ;;  %4582 = vmatpush3.bf16.msra.mxu1 %v4962_v53  ;;  %v4008_v53 = vld [vmem:[%s554_s29 + $0x1] ss:$0 sm:$0xff] }
 0x231   : > { %4503 = vmatprep.subr.bf16.mxu0 %v4963_v46  ;;  %4583 = vmatprep.subr.bf16.mxu1 %v5146_v58 }
 0x234   : > { %4504 = vmatpush3.bf16.msra.mxu0 %v4964_v47  ;;  %4584 = vmatpush3.bf16.msra.mxu1 %v4965_v17 }
 0x235   : > { %4505 = vmatprep.subr.bf16.mxu0 %v4966_v7  ;;  %4585 = vmatprep.subr.bf16.mxu1 %v5146_v58 }
 0x238   : > { %4506 = vmatpush3.bf16.msra.mxu0 %v4967_v12  ;;  %4586 = vmatpush3.bf16.msra.mxu1 %v4968_v50 }
 0x239   : > { %4507 = vmatprep.subr.bf16.mxu0 %v4969_v51  ;;  %4587 = vmatprep.subr.bf16.mxu1 %v5146_v58 }
 0x23c   : > { %4508 = vmatpush3.bf16.msra.mxu0 %v4970_v52  ;;  %4588 = vmatpush3.bf16.msra.mxu1 %v4971_v55 }
 0x23d   : > { %4509 = vmatprep.subr.bf16.mxu0 %v4972_v57  ;;  %4589 = vmatprep.subr.bf16.mxu1 %v5146_v58 }
 0x240   : > { %4510 = vmatpush3.bf16.msra.mxu0 %v4973_v59  ;;  %4590 = vmatpush3.bf16.msra.mxu1 %v4974_v60 }
 0x241   : > { %4511 = vmatprep.subr.bf16.mxu0 %v4975_v61  ;;  %4591 = vmatprep.subr.bf16.mxu1 %v5146_v58 }
 0x244   : > { %4512 = vmatpush3.bf16.msra.mxu0 %v4976_v62  ;;  %4592 = vmatpush3.bf16.msra.mxu1 %v4977_v63 }
 0x245   : > { %4597 = vmatprep.subr.bf16.mxu1 %v5146_v58  ;;  %3392 = vmatprep.subr.bf16.mxu0 %v4980_v2 }
 0x247   : > { %3163 = vmatmul.mubr.bf16.vlgmr.msra.gmra.mrb[32].mxu0 %v5541_v21  ;;  %4594 = vmatmul.mubr.bf16.vlgmr.msra.gmra.mrb[32].mxu1 %v5010_v0  ;;  %v4985_v21 = vld [vmem:[%s5538_s23 + $0xe0] ss:$12 sps:$4 sm:$0xff]  }
 0x248   : > { %3424 = vmatprep.mubr.bf16.mxu0 %v5148_v56  ;;  %4613 = vmatprep.mubr.msk.bf16.mxu1 %vm5147_vm0, %v5146_v58  ;;  %v4988_v56 = vld [vmem:[%s5538_s23 + $0xf4] ss:$12 sps:$4 sm:$0xff]  }
 0x249   : > { %4598 = vmatpush3.bf16.msra.mxu1 %v4981_v3  ;;  %3393 = vmatpush1.bf16.msra.mxu0 %v4978_v1 }
 0x24a   : > { %4599 = vmatprep.subr.bf16.mxu1 %v5146_v58  ;;  %3394 = vmatprep.subr.bf16.mxu0 %v4984_v4 }
 0x24d   : > { %4600 = vmatpush3.bf16.msra.mxu1 %v4985_v21  ;;  %3395 = vmatpush1.bf16.msra.mxu0 %v4982_v5 }
 0x24e   : > { %4601 = vmatprep.subr.bf16.mxu1 %v5146_v58  ;;  %3396 = vmatprep.subr.bf16.mxu0 %v4988_v56 }
 0x251   : > { %4602 = vmatpush3.bf16.msra.mxu1 %v4989_v8  ;;  %3397 = vmatpush1.bf16.msra.mxu0 %v4986_v9 }
 0x252   : > { %4603 = vmatprep.subr.bf16.mxu1 %v5146_v58  ;;  %3398 = vmatprep.subr.bf16.mxu0 %v4992_v10 }
 0x255   : > { %4604 = vmatpush3.bf16.msra.mxu1 %v4993_v13  ;;  %3399 = vmatpush1.bf16.msra.mxu0 %v4990_v38 }
 0x256   : > { %4605 = vmatprep.subr.bf16.mxu1 %v5146_v58  ;;  %3400 = vmatprep.subr.bf16.mxu0 %v4996_v14 }
 0x259   : > { %4606 = vmatpush3.bf16.msra.mxu1 %v4997_v15  ;;  %3401 = vmatpush1.bf16.msra.mxu0 %v4994_v6 }
 0x25a   : > { %4607 = vmatprep.subr.bf16.mxu1 %v5146_v58  ;;  %3402 = vmatprep.subr.bf16.mxu0 %v5000_v23 }
 0x25d   : > { %3403 = vmatpush1.bf16.msra.mxu0 %v4998_v24  ;;  %4608 = vmatpush3.bf16.msra.mxu1 %v5001_v25 }
 0x25e   : > { %4609 = vmatprep.subr.bf16.mxu1 %v5146_v58  ;;  %3404 = vmatprep.subr.bf16.mxu0 %v5004_v39 }
 0x261   : > { %3405 = vmatpush1.bf16.msra.mxu0 %v5002_v42  ;;  %4610 = vmatpush3.bf16.msra.mxu1 %v5005_v43 }
 0x262   : > { %4611 = vmatprep.subr.bf16.mxu1 %v5146_v58  ;;  %3406 = vmatprep.subr.bf16.mxu0 %v5008_v44 }
 0x265   : > { %3407 = vmatpush1.bf16.msra.mxu0 %v5006_v32  ;;  %4612 = vmatpush3.bf16.msra.mxu1 %v5009_v37 }
 0x29a   : > { %v1870_v26 = vpop.f32.mrb[16].mxu0  ;;  %v1911_v27 = vpop.f32.mrb[16].mxu1 }
 0x29b   : > { %v1871_v28 = vadd.f32 %v1870_v26, %v1696_v49  ;;  %v1912_v29 = vadd.f32 %v1911_v27, %v1704_v54  ;;  %v1872_v30 = vpop.f32.mrb[17].mxu0  ;;  %v4575_v31 = vpop.f32.mrb[17].mxu1 }
 0x29c   : > { %v1873_v34 = vadd.f32 %v1872_v30, %v1700_v22  ;;  %v1874_v35 = vpop.f32.mrb[18].mxu0  ;;  %v1914_v36 = vpop.f32.mrb[18].mxu1 }
 0x29d   : > { %1917 = vst [vmem:[%s5778_s11] sm:$0xff] %v1871_v28  ;;  %1919 = vst [vmem:[%s5778_s11 + $0x10] sm:$0xff] %v1912_v29  ;;  %v1875_v40 = vpop.f32.mrb[19].mxu0  ;;  %v4576_v41 = vpop.f32.mrb[19].mxu1  ;;  %v4163_v35 = vld [vmem:[%s5761_s22 + $0x3] sm:$0x7] }
 0x29e   : > { %1918 = vst [vmem:[%s5778_s11 + $0x8] sm:$0xff] %v1873_v34  ;;  %v3252_v36 = vrot.slane %v4163_v35, %v1695_v11  ;;  %v3260_v39 = vrot.slane %v4163_v35, %v1703_v18  ;;  %v3256_v40 = vrot.slane %v4163_v35, %v1699_v20 }
 0x2ba   : > { %v4381_v45 = vpop.f32.mrb[20].mxu0  ;;  %v4403_v48 = vpop.f32.mrb[20].mxu1 }
 0x2bb   : > { %v4382_v46 = vpop.f32.mrb[21].mxu0  ;;  %v4404_v47 = vpop.f32.mrb[21].mxu1 }
 0x2bc   : > { %v4383_v17 = vadd.f32 %v4382_v46, %v4381_v45  ;;  %v4384_v7 = vpop.f32.mrb[22].mxu0  ;;  %v4405_v12 = vadd.f32 %v4404_v47, %v4403_v48  ;;  %v4406_v50 = vpop.f32.mrb[22].mxu1 }
 0x2bd   : > { %v4385_v51 = vpop.f32.mrb[23].mxu0  ;;  %v4407_v52 = vpop.f32.mrb[23].mxu1 }
 0x2be   : > { %v2925_v55 = vadd.f32 %v4383_v17, %v4008_v53 }
 0x2c0   : > { %v2965_v57 = vadd.f32 %v4405_v12, %v2925_v55 }
 0x2da   : > { %v4425_v58 = vpop.f32.mrb[24].mxu0  ;;  %v4447_v59 = vpop.f32.mrb[24].mxu1 }
 0x2db   : > { %v4426_v60 = vpop.f32.mrb[25].mxu0  ;;  %v4448_v61 = vpop.f32.mrb[25].mxu1 }
 0x2dc   : > { %v4427_v62 = vadd.f32 %v4426_v60, %v4425_v58  ;;  %v4428_v63 = vpop.f32.mrb[26].mxu0  ;;  %v4449_v0 = vadd.f32 %v4448_v61, %v4447_v59  ;;  %v4450_v1 = vpop.f32.mrb[26].mxu1 }
 0x2dd   : > { %v4429_v2 = vpop.f32.mrb[27].mxu0  ;;  %v4451_v3 = vpop.f32.mrb[27].mxu1 }
 0x2de   : > { %v3005_v4 = vadd.f32 %v4427_v62, %v2965_v57 }
 0x2e0   : > { %v3045_v21 = vadd.f32 %v4449_v0, %v3005_v4 }
 0x2fa   : > { %v4469_v5 = vpop.f32.mrb[28].mxu0  ;;  %v4491_v56 = vpop.f32.mrb[28].mxu1 }
 0x2fb   : > { %v4470_v8 = vpop.f32.mrb[29].mxu0  ;;  %v4492_v9 = vpop.f32.mrb[29].mxu1 }
 0x2fc   : > { %v4471_v10 = vadd.f32 %v4470_v8, %v4469_v5  ;;  %v4472_v13 = vpop.f32.mrb[30].mxu0  ;;  %v4493_v33 = vadd.f32 %v4492_v9, %v4491_v56  ;;  %v4494_v38 = vpop.f32.mrb[30].mxu1 }
 0x2fd   : > { %v4473_v14 = vpop.f32.mrb[31].mxu0  ;;  %v4495_v15 = vpop.f32.mrb[31].mxu1 }
 0x2fe   : > { %v3085_v6 = vadd.f32 %v4471_v10, %v3045_v21 }
 0x300   : > { %v3125_v19 = vadd.f32 %v4493_v33, %v3085_v6 }
 0x31a   : > { %v4513_v49 = vpop.f32.mrb[32].mxu0  ;;  %v3204_v54 = vpop.f32.mrb[32].mxu1 }
 0x31b   : > { %v4514_v22 = vpop.f32.mrb[33].mxu0  ;;  %v4595_v23 = vpop.f32.mrb[33].mxu1 }
 0x31c   : > { %v4515_v24 = vadd.f32 %v4514_v22, %v4513_v49  ;;  %v4516_v25 = vpop.f32.mrb[34].mxu0  ;;  %v3207_v26 = vpop.f32.mrb[34].mxu1 }
 0x31d   : > { %v4517_v27 = vpop.f32.mrb[35].mxu0  ;;  %v4596_v28 = vpop.f32.mrb[35].mxu1 }
 0x31e   : > { %v3165_v29 = vadd.f32 %v4515_v24, %v3125_v19 }
 0x320   : > { %v3205_v30 = vadd.f32 %v3204_v54, %v3165_v29 }
 0x322   : > { %v3210_v31 = vmax.f32 %v3205_v30, 0.0 }
 0x324   : > { %v3211_v34 = vpack.c.bf16 %v3210_v31, %v3210_v31 }
 0x326   : > { %3425 = vmatmul.mubr.bf16.vlgmr.msra.gmra.mrb[36].mxu0 %v3211_v34  ;;  %4614 = vmatmul.mubr.bf16.vlgmr.msra.gmra.mrb[36].mxu1 %v3211_v34 }
 0x3f9   : > { %v3426_v41 = vpop.f32.mrb[36].mxu0  ;;  %v3467_v42 = vpop.f32.mrb[36].mxu1 }
 0x3fa   : > { %v3427_v43 = vadd.f32 %v3426_v41, %v3252_v36  ;;  %v3468_v44 = vadd.f32 %v3467_v42, %v3260_v39  ;;  %v3428_v32 = vpop.f32.mrb[37].mxu0  ;;  %v4615_v37 = vpop.f32.mrb[37].mxu1 }
 0x3fb   : > { %v3429_v45 = vadd.f32 %v3428_v32, %v3256_v40  ;;  %v3430_v48 = vpop.f32.mrb[38].mxu0  ;;  %v3470_v53 = vpop.f32.mrb[38].mxu1 }
 0x3fc   : > { %4188 = vst [vmem:[%s5778_s11 + $0x18] sm:$0xff] %v3427_v43  ;;  %4190 = vst [vmem:[%s5778_s11 + $0x28] sm:$0xff] %v3468_v44  ;;  %v3431_v46 = vpop.f32.mrb[39].mxu0  ;;  %v4616_v11 = vpop.f32.mrb[39].mxu1 }
 0x3fd   : > { %4189 = vst [vmem:[%s5778_s11 + $0x20] sm:$0xff] %v3429_v45 }
 0x3fe PF: > { %p16_p9 = scmp.ge.s32.totalorder %s5272_s12, 4   ;;  %s5833_s18 = smov %s5127_s19 }
 0x3ff   : > { %s5834_s19 = smov %s5131_s20  ;;  %s5835_s20 = smov %s5281_s15 }
 0x400   : > { %s5836_s21 = smov %s5272_s12  ;;  %18 = sbr.rel (!%p16_p9) target bundleno = 4 (0x4), region = 98 }
 0x407   :  { %3501 = vsyncpa [#allocation3], 1 }
 0x408   :  { %3503 = vsyncpa [#allocation3 + $0x1], 1 }
 0x409   :  { %3504 = vsyncpa [#allocation5], 1 }

</bundles_post_ra>
